<compile_context>
chip_gen: v5e
topology: v5e:2x2
jax: 0.10.0
libtpu: 0.0.40
codegen_flags: <defaults>
</compile_context>

<pallas_src>
import functools

import numpy as np

import jax
import jax.numpy as jnp
from jax.experimental import pallas as pl
from jax.experimental.pallas import tpu as pltpu


# ----------------------------------------------------------------------------
# Static (numpy) helpers: fused upsample+pad matrix and per-tap edge masks.
# ----------------------------------------------------------------------------
def _interp_matrix(out_size, in_size):
    """(out_size, in_size) bilinear interpolation matrix, align_corners=True."""
    A = np.zeros((out_size, in_size), np.float32)
    if in_size == 1:
        A[:, 0] = 1.0
        return A
    scale = (in_size - 1) / (out_size - 1)
    for i in range(out_size):
        src = i * scale
        lo = int(np.floor(src))
        hi = min(lo + 1, in_size - 1)
        frac = src - lo
        A[i, lo] += 1.0 - frac
        A[i, hi] += frac
    return A


def _upsample_pad_matrix(H1, W1, H, W):
    """(H*W, H1*W1) matrix: bilinear x2 upsample (align_corners=True) of a
    flattened (H1, W1) image followed by F.pad-style centre alignment onto the
    (H, W) canvas (negative diffs crop, matching F.pad semantics)."""
    H2, W2 = 2 * H1, 2 * W1
    U = np.kron(_interp_matrix(H2, H1), _interp_matrix(W2, W1))  # (H2*W2,H1*W1)
    top = (H - H2) // 2
    left = (W - W2) // 2
    P = np.zeros((H * W, H1 * W1), np.float32)
    for i in range(H2):
        ci = i + top
        if ci < 0 or ci >= H:
            continue
        for j in range(W2):
            cj = j + left
            if cj < 0 or cj >= W:
                continue
            P[ci * W + cj, :] = U[i * W2 + j, :]
    return P


def _tap_masks(H, W):
    """(9, H*W) 0/1 masks: tap t=(dy+1)*3+(dx+1) is valid at output pixel p iff
    the read pixel (y+dy, x+dx) lies inside the canvas (== conv zero pad)."""
    L = H * W
    ys, xs = np.divmod(np.arange(L), W)
    masks = np.zeros((9, L), np.float32)
    t = 0
    for dy in (-1, 0, 1):
        for dx in (-1, 0, 1):
            ok = (ys + dy >= 0) & (ys + dy < H) & (xs + dx >= 0) & (xs + dx < W)
            masks[t] = ok.astype(np.float32)
            t += 1
    return masks


# ----------------------------------------------------------------------------
# Fused kernel: (upsample + F.pad) -> concat/checker -> conv1+BN+ReLU ->
# conv2+BN+ReLU.  One grid step per batch element; everything stays in VMEM.
# ----------------------------------------------------------------------------
def _make_up_kernel(H, W, C2, c2_use, c1_use, Cmid, Cout):
    L = H * W
    OFFS = tuple((dy, dx) for dy in (-1, 0, 1) for dx in (-1, 0, 1))

    def kernel(x1_ref, x2_ref, up_ref, masks_ref, w1_ref, s1_ref, b1_ref,
               w2_ref, s2_ref, b2_ref, o_ref):
        # x1_ref   : (1, c1|1, H1*W1)  raw (pre-upsample) x1, channel-major flat
        # x2_ref   : (1, c2_use, L)    skip connection, channel-major flat
        # up_ref   : (H1*W1, L)        fused upsample + F.pad placement matrix
        # masks_ref: (9, L)            per-tap edge validity (0/1)
        # w1_ref   : (9, Cmid, Cin)    conv1 taps, transposed to (out, in)
        # w2_ref   : (9, Cout, Cmid)   conv2 taps
        # s*/b*    : (C, 1)            folded conv-bias + BatchNorm affine
        # o_ref    : (1, Cout, L)
        m_all = masks_ref[...]                                   # (9, L)

        def conv3x3(groups, w_all, n_out):
            # groups: [(value (Cg, L), weight input-channel offset)]
            acc = jnp.zeros((n_out, L), jnp.float32)
            for t, (dy, dx) in enumerate(OFFS):
                shift = (-(dy * W + dx)) % L      # static, non-negative
                contrib = jnp.zeros((n_out, L), jnp.float32)
                for val, c0 in groups:
                    cg = val.shape[0]
                    shifted = (pltpu.roll(val, shift=shift, axis=1)
                               if shift else val)
                    contrib = contrib + jnp.dot(
                        w_all[t, :, c0:c0 + cg], shifted,
                        preferred_element_type=jnp.float32)
                if dy == 0 and dx == 0:
                    acc = acc + contrib
                else:
                    acc = acc + contrib * m_all[t:t + 1, :]
            return acc

        # conv-1 input = torch.cat([x2, up(x1)], 1) passed through
        # input_checker, realized as static channel groups (truncated channels
        # were dropped in the wrapper; zero-fill channels contribute nothing
        # and are skipped).
        groups = [(x2_ref[0], 0)]
        if c1_use > 0:
            x1_canvas = jnp.dot(x1_ref[0], up_ref[...],
                                preferred_element_type=jnp.float32)  # (c1, L)
            groups.append((x1_canvas, C2))

        y1 = conv3x3(groups, w1_ref[...], Cmid)
        y1 = jnp.maximum(y1 * s1_ref[...] + b1_ref[...], 0.0)        # (Cmid,L)

        y2 = conv3x3([(y1, 0)], w2_ref[...], Cout)
        y2 = jnp.maximum(y2 * s2_ref[...] + b2_ref[...], 0.0)        # (Cout,L)

        o_ref[0] = y2.astype(o_ref.dtype)

    return kernel


# ----------------------------------------------------------------------------
# Parameter construction (deterministic) and Up.forward wrapper.
# ----------------------------------------------------------------------------
def make_up_params(key, in_channels, out_channels, coef_width):
    """Conv weights ~ deterministic normal; BN in eval mode (running stats)."""
    del in_channels
    eps = 1e-5
    ks = jax.random.split(key, 8)

    def conv_params(kw, kb, cin, cout):
        w = jax.random.normal(kw, (3, 3, cin, cout), jnp.float32) * 0.1
        b = jax.random.normal(kb, (cout,), jnp.float32) * 0.1
        return w, b

    def bn_params(kg, kb, c):
        gamma = 1.0 + 0.1 * jax.random.normal(kg, (c,), jnp.float32)
        beta = 0.1 * jax.random.normal(kb, (c,), jnp.float32)
        mean = jnp.zeros((c,), jnp.float32)
        var = jnp.ones((c,), jnp.float32)
        return gamma, beta, mean, var

    w1, b1 = conv_params(ks[0], ks[1], coef_width, out_channels)
    g1, be1, m1, v1 = bn_params(ks[2], ks[3], out_channels)
    w2, b2 = conv_params(ks[4], ks[5], out_channels, out_channels)
    g2, be2, m2, v2 = bn_params(ks[6], ks[7], out_channels)

    def fold(conv_b, gamma, beta, mean, var):
        scale = gamma / jnp.sqrt(var + eps)
        bias = beta + (conv_b - mean) * scale
        return scale, bias

    s1, fb1 = fold(b1, g1, be1, m1, v1)
    s2, fb2 = fold(b2, g2, be2, m2, v2)
    return dict(w1=w1, scale1=s1, bias1=fb1, w2=w2, scale2=s2, bias2=fb2)


def up_forward(params, x1_nchw, x2_nchw, coef_width):
    """Reproduces Up.forward.  Inputs/outputs are NCHW (PyTorch convention)."""
    x1 = x1_nchw.astype(jnp.float32)
    x2 = x2_nchw.astype(jnp.float32)
    B, C1, H1, W1 = x1.shape
    B2, C2, H, W = x2.shape
    assert B == B2
    L = H * W

    Cin = coef_width
    Cmid = params["w1"].shape[-1]
    Cout = params["w2"].shape[-1]
    assert params["w1"].shape[2] == Cin

    # input_checker bookkeeping (static): concat is [x2 (C2), x1 (C1)] then
    # truncated / zero-filled to Cin channels.
    c2_use = min(C2, Cin)
    c1_use = min(C1, max(Cin - C2, 0))

    # Channel-major flat layout (metadata-only reshapes; slices only copy in
    # the rare truncation case).
    x2_k = x2[:, :c2_use].reshape(B, c2_use, L)
    if c1_use > 0:
        x1_k = x1[:, :c1_use].reshape(B, c1_use, H1 * W1)
    else:  # x1 fully dropped by input_checker: pass a dummy the kernel ignores
        x1_k = x1[:, :1].reshape(B, 1, H1 * W1)
    x1_ch = x1_k.shape[1]

    # Static matrices: fused upsample + F.pad placement, and per-tap masks.
    up_t = jnp.asarray(_upsample_pad_matrix(H1, W1, H, W).T)    # (H1*W1, L)
    masks = jnp.asarray(_tap_masks(H, W))                       # (9, L)

    # Per-tap transposed weights for (Cout, Cg) @ (Cg, L) MXU matmuls.
    w1_t = jnp.transpose(params["w1"], (0, 1, 3, 2)).reshape(9, Cmid, Cin)
    w2_t = jnp.transpose(params["w2"], (0, 1, 3, 2)).reshape(9, Cout, Cmid)
    s1 = params["scale1"].reshape(Cmid, 1).astype(jnp.float32)
    b1 = params["bias1"].reshape(Cmid, 1).astype(jnp.float32)
    s2 = params["scale2"].reshape(Cout, 1).astype(jnp.float32)
    b2 = params["bias2"].reshape(Cout, 1).astype(jnp.float32)

    kernel = _make_up_kernel(H=H, W=W, C2=C2, c2_use=c2_use, c1_use=c1_use,
                             Cmid=Cmid, Cout=Cout)

    out_flat = pl.pallas_call(
        kernel,
        out_shape=jax.ShapeDtypeStruct((B, Cout, L), jnp.float32),
        grid=(B,),
        in_specs=[
            pl.BlockSpec((1, x1_ch, H1 * W1), lambda b: (b, 0, 0)),
            pl.BlockSpec((1, c2_use, L), lambda b: (b, 0, 0)),
            pl.BlockSpec((H1 * W1, L), lambda b: (0, 0)),
            pl.BlockSpec((9, L), lambda b: (0, 0)),
            pl.BlockSpec((9, Cmid, Cin), lambda b: (0, 0, 0)),
            pl.BlockSpec((Cmid, 1), lambda b: (0, 0)),
            pl.BlockSpec((Cmid, 1), lambda b: (0, 0)),
            pl.BlockSpec((9, Cout, Cmid), lambda b: (0, 0, 0)),
            pl.BlockSpec((Cout, 1), lambda b: (0, 0)),
            pl.BlockSpec((Cout, 1), lambda b: (0, 0)),
        ],
        out_specs=pl.BlockSpec((1, Cout, L), lambda b: (b, 0, 0)),
        compiler_params=pltpu.CompilerParams(
            dimension_semantics=("parallel",)),
    )(x1_k, x2_k, up_t, masks, w1_t, s1, b1, w2_t, s2, b2)

    return out_flat.reshape(B, Cout, H, W)


# ----------------------------------------------------------------------------
# Pure-JAX reference (correctness cross-check only).
# ----------------------------------------------------------------------------
def bilinear_up2_align_corners(x):
    """x: (B, H, W, C) -> (B, 2H, 2W, C), nn.Upsample(2, bilinear, align=True)."""
    B, H, W, C = x.shape
    Ho, Wo = 2 * H, 2 * W

    def coords(out_size, in_size):
        if in_size == 1:
            idx = jnp.zeros((out_size,), jnp.int32)
            return idx, idx, jnp.zeros((out_size,), jnp.float32)
        src = jnp.arange(out_size, dtype=jnp.float32) * (
            (in_size - 1) / (out_size - 1))
        lo = jnp.floor(src).astype(jnp.int32)
        hi = jnp.minimum(lo + 1, in_size - 1)
        frac = src - lo.astype(jnp.float32)
        return lo, hi, frac

    y0, y1, fy = coords(Ho, H)
    x0, x1, fx = coords(Wo, W)
    rows = (x[:, y0, :, :] * (1.0 - fy)[None, :, None, None]
            + x[:, y1, :, :] * fy[None, :, None, None])
    out = (rows[:, :, x0, :] * (1.0 - fx)[None, None, :, None]
           + rows[:, :, x1, :] * fx[None, None, :, None])
    return out


def _ref_align_nhwc(x, H, W):
    """F.pad([dX//2, dX-dX//2, dY//2, dY-dY//2]) in NHWC (negative pads crop)."""
    _, h, w, _ = x.shape
    dY, dX = H - h, W - w
    top, left = dY // 2, dX // 2
    cfg = ((0, 0, 0), (top, dY - top, 0), (left, dX - left, 0), (0, 0, 0))
    return jax.lax.pad(x, jnp.array(0.0, x.dtype), cfg)


def input_checker_nhwc(x, targ_channel):
    c = x.shape[-1]
    if c > targ_channel:
        return x[..., :targ_channel]
    if c < targ_channel:
        pad = jnp.zeros(x.shape[:-1] + (targ_channel - c,), x.dtype)
        return jnp.concatenate([x, pad], axis=-1)
    return x


def _ref_conv3x3_bn_relu(x_nhwc, w_hwio, scale, bias):
    y = jax.lax.conv_general_dilated(
        x_nhwc, w_hwio, window_strides=(1, 1), padding="SAME",
        dimension_numbers=("NHWC", "HWIO", "NHWC"))
    y = y * scale[None, None, None, :] + bias[None, None, None, :]
    return jnp.maximum(y, 0.0)


def up_reference(params, x1_nchw, x2_nchw, coef_width):
    x1 = jnp.transpose(x1_nchw, (0, 2, 3, 1)).astype(jnp.float32)
    x2 = jnp.transpose(x2_nchw, (0, 2, 3, 1)).astype(jnp.float32)
    x1u = bilinear_up2_align_corners(x1)
    x1a = _ref_align_nhwc(x1u, x2.shape[1], x2.shape[2])
    x = jnp.concatenate([x2, x1a], axis=-1)
    x = input_checker_nhwc(x, coef_width)
    y = _ref_conv3x3_bn_relu(x, params["w1"], params["scale1"], params["bias1"])
    y = _ref_conv3x3_bn_relu(y, params["w2"], params["scale2"], params["bias2"])
    return jnp.transpose(y, (0, 3, 1, 2))


# ----------------------------------------------------------------------------
if __name__ == "__main__":
    root = jax.random.PRNGKey(0)

    def run_case(name, key, B, C1, H1, W1, C2, H, W, coef_width, out_channels):
        k1, k2, kp = jax.random.split(key, 3)
        x1 = jax.random.normal(k1, (B, C1, H1, W1), jnp.float32)
        x2 = jax.random.normal(k2, (B, C2, H, W), jnp.float32)
        params = make_up_params(kp, C1 + C2, out_channels, coef_width)

        out = jax.jit(functools.partial(up_forward, coef_width=coef_width))(
            params, x1, x2)
        out = jax.block_until_ready(out)
        assert out.shape == (B, out_channels, H, W), (name, out.shape)

        ref = up_reference(params, x1, x2, coef_width)
        err = float(jnp.max(jnp.abs(out - ref)))
        assert jnp.allclose(out, ref, atol=5e-4, rtol=5e-4), (name, err)

    keys = jax.random.split(root, 3)
    # A) canonical UNet Up: Up(8, 4, coef_width=8); x1 from below (half res).
    run_case("standard", keys[0], B=2, C1=4, H1=8, W1=8, C2=4, H=16, W=16,
             coef_width=8, out_channels=4)
    # B) exercises the F.pad alignment path (14x14 -> 16x16) and the
    #    input_checker zero-fill path (concat 8 ch -> coef_width 12).
    run_case("pad_and_zero_fill", keys[1], B=2, C1=4, H1=7, W1=7, C2=4,
             H=16, W=16, coef_width=12, out_channels=4)
    # C) exercises the input_checker truncation path (concat 12 ch -> 4 ch,
    #    upsampled x1 dropped entirely).
    run_case("truncate", keys[2], B=1, C1=4, H1=8, W1=8, C2=8, H=16, W=16,
             coef_width=4, out_channels=4)

    print("KERNEL_OK")
</pallas_src>

<mosaic_0001>
module attributes {stable_mosaic.version = 11 : i64} {
  func.func @kernel(%arg0: i32, %arg1: memref<1x4x64xf32, #tpu.memory_space<vmem>>, %arg2: memref<1x4x256xf32, #tpu.memory_space<vmem>>, %arg3: memref<64x256xf32, #tpu.memory_space<vmem>>, %arg4: memref<9x256xf32, #tpu.memory_space<vmem>>, %arg5: memref<9x4x8xf32, #tpu.memory_space<vmem>>, %arg6: memref<4x1xf32, #tpu.memory_space<vmem>>, %arg7: memref<4x1xf32, #tpu.memory_space<vmem>>, %arg8: memref<9x4x4xf32, #tpu.memory_space<vmem>>, %arg9: memref<4x1xf32, #tpu.memory_space<vmem>>, %arg10: memref<4x1xf32, #tpu.memory_space<vmem>>, %arg11: memref<1x4x256xf32, #tpu.memory_space<vmem>>) attributes {dimension_semantics = [#tpu.dimension_semantics<parallel>], iteration_bounds = array<i64: 2>, scalar_prefetch = 0 : i64, scratch_operands = 0 : i64, tpu.core_type = #tpu.core_type<tc>, window_params = [{transform_indices = @transform_0, window_bounds = array<i64: 1, 4, 64>}, {transform_indices = @transform_1, window_bounds = array<i64: 1, 4, 256>}, {pipeline_mode = #tpu.pipeline_mode<synchronous>, transform_indices = @transform_2, window_bounds = array<i64: 64, 256>}, {pipeline_mode = #tpu.pipeline_mode<synchronous>, transform_indices = @transform_3, window_bounds = array<i64: 9, 256>}, {pipeline_mode = #tpu.pipeline_mode<synchronous>, transform_indices = @transform_4, window_bounds = array<i64: 9, 4, 8>}, {pipeline_mode = #tpu.pipeline_mode<synchronous>, transform_indices = @transform_5, window_bounds = array<i64: 4, 1>}, {pipeline_mode = #tpu.pipeline_mode<synchronous>, transform_indices = @transform_6, window_bounds = array<i64: 4, 1>}, {pipeline_mode = #tpu.pipeline_mode<synchronous>, transform_indices = @transform_7, window_bounds = array<i64: 9, 4, 4>}, {pipeline_mode = #tpu.pipeline_mode<synchronous>, transform_indices = @transform_8, window_bounds = array<i64: 4, 1>}, {pipeline_mode = #tpu.pipeline_mode<synchronous>, transform_indices = @transform_9, window_bounds = array<i64: 4, 1>}, {transform_indices = @transform_10, window_bounds = array<i64: 1, 4, 256>}]} {
    %c0 = arith.constant 0 : index
    %c0_0 = arith.constant 0 : index
    %0 = vector.load %arg4[%c0, %c0_0] : memref<9x256xf32, #tpu.memory_space<vmem>>, vector<9x256xf32>
    %c0_1 = arith.constant 0 : index
    %c0_2 = arith.constant 0 : index
    %c0_3 = arith.constant 0 : index
    %1 = vector.load %arg2[%c0_1, %c0_2, %c0_3] : memref<1x4x256xf32, #tpu.memory_space<vmem>>, vector<1x4x256xf32>
    %2 = vector.shape_cast %1 : vector<1x4x256xf32> to vector<4x256xf32>
    %c0_4 = arith.constant 0 : index
    %c0_5 = arith.constant 0 : index
    %c0_6 = arith.constant 0 : index
    %3 = vector.load %arg1[%c0_4, %c0_5, %c0_6] : memref<1x4x64xf32, #tpu.memory_space<vmem>>, vector<1x4x64xf32>
    %4 = vector.shape_cast %3 : vector<1x4x64xf32> to vector<4x64xf32>
    %c0_7 = arith.constant 0 : index
    %c0_8 = arith.constant 0 : index
    %5 = vector.load %arg3[%c0_7, %c0_8] : memref<64x256xf32, #tpu.memory_space<vmem>>, vector<64x256xf32>
    %cst = arith.constant dense<0.000000e+00> : vector<4x256xf32>
    %6 = tpu.matmul %4, %5, %cst {dimension_numbers = #tpu.dot_dimension_numbers<[1], [0], [0], [1], [0, 0, 1, 1], [], []>} : vector<4x64xf32>, vector<64x256xf32>, vector<4x256xf32> -> vector<4x256xf32>
    %c0_9 = arith.constant 0 : index
    %c0_10 = arith.constant 0 : index
    %c0_11 = arith.constant 0 : index
    %7 = vector.load %arg5[%c0_9, %c0_10, %c0_11] : memref<9x4x8xf32, #tpu.memory_space<vmem>>, vector<9x4x8xf32>
    %cst_12 = arith.constant 0.000000e+00 : f32
    %8 = vector.broadcast %cst_12 : f32 to vector<4x256xf32>
    %cst_13 = arith.constant 0.000000e+00 : f32
    %9 = vector.broadcast %cst_13 : f32 to vector<4x256xf32>
    %c17_i32 = arith.constant 17 : i32
    %10 = tpu.dynamic_rotate %2 by %c17_i32 dim 1 : vector<4x256xf32>, i32 -> vector<4x256xf32>
    %11 = vector.extract_strided_slice %7 {offsets = [0, 0, 0], sizes = [1, 4, 4], strides = [1, 1, 1]} : vector<9x4x8xf32> to vector<1x4x4xf32>
    %12 = vector.shape_cast %11 : vector<1x4x4xf32> to vector<4x4xf32>
    %cst_14 = arith.constant dense<0.000000e+00> : vector<4x256xf32>
    %13 = tpu.matmul %12, %10, %cst_14 {dimension_numbers = #tpu.dot_dimension_numbers<[1], [0], [0], [1], [0, 0, 1, 1], [], []>} : vector<4x4xf32>, vector<4x256xf32>, vector<4x256xf32> -> vector<4x256xf32>
    %14 = arith.addf %9, %13 : vector<4x256xf32>
    %c17_i32_15 = arith.constant 17 : i32
    %15 = tpu.dynamic_rotate %6 by %c17_i32_15 dim 1 : vector<4x256xf32>, i32 -> vector<4x256xf32>
    %16 = vector.extract_strided_slice %7 {offsets = [0, 0, 4], sizes = [1, 4, 4], strides = [1, 1, 1]} : vector<9x4x8xf32> to vector<1x4x4xf32>
    %17 = vector.shape_cast %16 : vector<1x4x4xf32> to vector<4x4xf32>
    %cst_16 = arith.constant dense<0.000000e+00> : vector<4x256xf32>
    %18 = tpu.matmul %17, %15, %cst_16 {dimension_numbers = #tpu.dot_dimension_numbers<[1], [0], [0], [1], [0, 0, 1, 1], [], []>} : vector<4x4xf32>, vector<4x256xf32>, vector<4x256xf32> -> vector<4x256xf32>
    %19 = arith.addf %14, %18 : vector<4x256xf32>
    %20 = vector.extract_strided_slice %0 {offsets = [0, 0], sizes = [1, 256], strides = [1, 1]} : vector<9x256xf32> to vector<1x256xf32>
    %21 = vector.broadcast %20 : vector<1x256xf32> to vector<4x256xf32>
    %22 = arith.mulf %19, %21 : vector<4x256xf32>
    %23 = arith.addf %8, %22 : vector<4x256xf32>
    %cst_17 = arith.constant 0.000000e+00 : f32
    %24 = vector.broadcast %cst_17 : f32 to vector<4x256xf32>
    %c16_i32 = arith.constant 16 : i32
    %25 = tpu.dynamic_rotate %2 by %c16_i32 dim 1 : vector<4x256xf32>, i32 -> vector<4x256xf32>
    %26 = vector.extract_strided_slice %7 {offsets = [1, 0, 0], sizes = [1, 4, 4], strides = [1, 1, 1]} : vector<9x4x8xf32> to vector<1x4x4xf32>
    %27 = vector.shape_cast %26 : vector<1x4x4xf32> to vector<4x4xf32>
    %cst_18 = arith.constant dense<0.000000e+00> : vector<4x256xf32>
    %28 = tpu.matmul %27, %25, %cst_18 {dimension_numbers = #tpu.dot_dimension_numbers<[1], [0], [0], [1], [0, 0, 1, 1], [], []>} : vector<4x4xf32>, vector<4x256xf32>, vector<4x256xf32> -> vector<4x256xf32>
    %29 = arith.addf %24, %28 : vector<4x256xf32>
    %c16_i32_19 = arith.constant 16 : i32
    %30 = tpu.dynamic_rotate %6 by %c16_i32_19 dim 1 : vector<4x256xf32>, i32 -> vector<4x256xf32>
    %31 = vector.extract_strided_slice %7 {offsets = [1, 0, 4], sizes = [1, 4, 4], strides = [1, 1, 1]} : vector<9x4x8xf32> to vector<1x4x4xf32>
    %32 = vector.shape_cast %31 : vector<1x4x4xf32> to vector<4x4xf32>
    %cst_20 = arith.constant dense<0.000000e+00> : vector<4x256xf32>
    %33 = tpu.matmul %32, %30, %cst_20 {dimension_numbers = #tpu.dot_dimension_numbers<[1], [0], [0], [1], [0, 0, 1, 1], [], []>} : vector<4x4xf32>, vector<4x256xf32>, vector<4x256xf32> -> vector<4x256xf32>
    %34 = arith.addf %29, %33 : vector<4x256xf32>
    %35 = vector.extract_strided_slice %0 {offsets = [1, 0], sizes = [1, 256], strides = [1, 1]} : vector<9x256xf32> to vector<1x256xf32>
    %36 = vector.broadcast %35 : vector<1x256xf32> to vector<4x256xf32>
    %37 = arith.mulf %34, %36 : vector<4x256xf32>
    %38 = arith.addf %23, %37 : vector<4x256xf32>
    %cst_21 = arith.constant 0.000000e+00 : f32
    %39 = vector.broadcast %cst_21 : f32 to vector<4x256xf32>
    %c15_i32 = arith.constant 15 : i32
    %40 = tpu.dynamic_rotate %2 by %c15_i32 dim 1 : vector<4x256xf32>, i32 -> vector<4x256xf32>
    %41 = vector.extract_strided_slice %7 {offsets = [2, 0, 0], sizes = [1, 4, 4], strides = [1, 1, 1]} : vector<9x4x8xf32> to vector<1x4x4xf32>
    %42 = vector.shape_cast %41 : vector<1x4x4xf32> to vector<4x4xf32>
    %cst_22 = arith.constant dense<0.000000e+00> : vector<4x256xf32>
    %43 = tpu.matmul %42, %40, %cst_22 {dimension_numbers = #tpu.dot_dimension_numbers<[1], [0], [0], [1], [0, 0, 1, 1], [], []>} : vector<4x4xf32>, vector<4x256xf32>, vector<4x256xf32> -> vector<4x256xf32>
    %44 = arith.addf %39, %43 : vector<4x256xf32>
    %c15_i32_23 = arith.constant 15 : i32
    %45 = tpu.dynamic_rotate %6 by %c15_i32_23 dim 1 : vector<4x256xf32>, i32 -> vector<4x256xf32>
    %46 = vector.extract_strided_slice %7 {offsets = [2, 0, 4], sizes = [1, 4, 4], strides = [1, 1, 1]} : vector<9x4x8xf32> to vector<1x4x4xf32>
    %47 = vector.shape_cast %46 : vector<1x4x4xf32> to vector<4x4xf32>
    %cst_24 = arith.constant dense<0.000000e+00> : vector<4x256xf32>
    %48 = tpu.matmul %47, %45, %cst_24 {dimension_numbers = #tpu.dot_dimension_numbers<[1], [0], [0], [1], [0, 0, 1, 1], [], []>} : vector<4x4xf32>, vector<4x256xf32>, vector<4x256xf32> -> vector<4x256xf32>
    %49 = arith.addf %44, %48 : vector<4x256xf32>
    %50 = vector.extract_strided_slice %0 {offsets = [2, 0], sizes = [1, 256], strides = [1, 1]} : vector<9x256xf32> to vector<1x256xf32>
    %51 = vector.broadcast %50 : vector<1x256xf32> to vector<4x256xf32>
    %52 = arith.mulf %49, %51 : vector<4x256xf32>
    %53 = arith.addf %38, %52 : vector<4x256xf32>
    %cst_25 = arith.constant 0.000000e+00 : f32
    %54 = vector.broadcast %cst_25 : f32 to vector<4x256xf32>
    %c1_i32 = arith.constant 1 : i32
    %55 = tpu.dynamic_rotate %2 by %c1_i32 dim 1 : vector<4x256xf32>, i32 -> vector<4x256xf32>
    %56 = vector.extract_strided_slice %7 {offsets = [3, 0, 0], sizes = [1, 4, 4], strides = [1, 1, 1]} : vector<9x4x8xf32> to vector<1x4x4xf32>
    %57 = vector.shape_cast %56 : vector<1x4x4xf32> to vector<4x4xf32>
    %cst_26 = arith.constant dense<0.000000e+00> : vector<4x256xf32>
    %58 = tpu.matmul %57, %55, %cst_26 {dimension_numbers = #tpu.dot_dimension_numbers<[1], [0], [0], [1], [0, 0, 1, 1], [], []>} : vector<4x4xf32>, vector<4x256xf32>, vector<4x256xf32> -> vector<4x256xf32>
    %59 = arith.addf %54, %58 : vector<4x256xf32>
    %c1_i32_27 = arith.constant 1 : i32
    %60 = tpu.dynamic_rotate %6 by %c1_i32_27 dim 1 : vector<4x256xf32>, i32 -> vector<4x256xf32>
    %61 = vector.extract_strided_slice %7 {offsets = [3, 0, 4], sizes = [1, 4, 4], strides = [1, 1, 1]} : vector<9x4x8xf32> to vector<1x4x4xf32>
    %62 = vector.shape_cast %61 : vector<1x4x4xf32> to vector<4x4xf32>
    %cst_28 = arith.constant dense<0.000000e+00> : vector<4x256xf32>
    %63 = tpu.matmul %62, %60, %cst_28 {dimension_numbers = #tpu.dot_dimension_numbers<[1], [0], [0], [1], [0, 0, 1, 1], [], []>} : vector<4x4xf32>, vector<4x256xf32>, vector<4x256xf32> -> vector<4x256xf32>
    %64 = arith.addf %59, %63 : vector<4x256xf32>
    %65 = vector.extract_strided_slice %0 {offsets = [3, 0], sizes = [1, 256], strides = [1, 1]} : vector<9x256xf32> to vector<1x256xf32>
    %66 = vector.broadcast %65 : vector<1x256xf32> to vector<4x256xf32>
    %67 = arith.mulf %64, %66 : vector<4x256xf32>
    %68 = arith.addf %53, %67 : vector<4x256xf32>
    %cst_29 = arith.constant 0.000000e+00 : f32
    %69 = vector.broadcast %cst_29 : f32 to vector<4x256xf32>
    %70 = vector.extract_strided_slice %7 {offsets = [4, 0, 0], sizes = [1, 4, 4], strides = [1, 1, 1]} : vector<9x4x8xf32> to vector<1x4x4xf32>
    %71 = vector.shape_cast %70 : vector<1x4x4xf32> to vector<4x4xf32>
    %cst_30 = arith.constant dense<0.000000e+00> : vector<4x256xf32>
    %72 = tpu.matmul %71, %2, %cst_30 {dimension_numbers = #tpu.dot_dimension_numbers<[1], [0], [0], [1], [0, 0, 1, 1], [], []>} : vector<4x4xf32>, vector<4x256xf32>, vector<4x256xf32> -> vector<4x256xf32>
    %73 = arith.addf %69, %72 : vector<4x256xf32>
    %74 = vector.extract_strided_slice %7 {offsets = [4, 0, 4], sizes = [1, 4, 4], strides = [1, 1, 1]} : vector<9x4x8xf32> to vector<1x4x4xf32>
    %75 = vector.shape_cast %74 : vector<1x4x4xf32> to vector<4x4xf32>
    %cst_31 = arith.constant dense<0.000000e+00> : vector<4x256xf32>
    %76 = tpu.matmul %75, %6, %cst_31 {dimension_numbers = #tpu.dot_dimension_numbers<[1], [0], [0], [1], [0, 0, 1, 1], [], []>} : vector<4x4xf32>, vector<4x256xf32>, vector<4x256xf32> -> vector<4x256xf32>
    %77 = arith.addf %73, %76 : vector<4x256xf32>
    %78 = arith.addf %68, %77 : vector<4x256xf32>
    %cst_32 = arith.constant 0.000000e+00 : f32
    %79 = vector.broadcast %cst_32 : f32 to vector<4x256xf32>
    %c255_i32 = arith.constant 255 : i32
    %80 = tpu.dynamic_rotate %2 by %c255_i32 dim 1 : vector<4x256xf32>, i32 -> vector<4x256xf32>
    %81 = vector.extract_strided_slice %7 {offsets = [5, 0, 0], sizes = [1, 4, 4], strides = [1, 1, 1]} : vector<9x4x8xf32> to vector<1x4x4xf32>
    %82 = vector.shape_cast %81 : vector<1x4x4xf32> to vector<4x4xf32>
    %cst_33 = arith.constant dense<0.000000e+00> : vector<4x256xf32>
    %83 = tpu.matmul %82, %80, %cst_33 {dimension_numbers = #tpu.dot_dimension_numbers<[1], [0], [0], [1], [0, 0, 1, 1], [], []>} : vector<4x4xf32>, vector<4x256xf32>, vector<4x256xf32> -> vector<4x256xf32>
    %84 = arith.addf %79, %83 : vector<4x256xf32>
    %c255_i32_34 = arith.constant 255 : i32
    %85 = tpu.dynamic_rotate %6 by %c255_i32_34 dim 1 : vector<4x256xf32>, i32 -> vector<4x256xf32>
    %86 = vector.extract_strided_slice %7 {offsets = [5, 0, 4], sizes = [1, 4, 4], strides = [1, 1, 1]} : vector<9x4x8xf32> to vector<1x4x4xf32>
    %87 = vector.shape_cast %86 : vector<1x4x4xf32> to vector<4x4xf32>
    %cst_35 = arith.constant dense<0.000000e+00> : vector<4x256xf32>
    %88 = tpu.matmul %87, %85, %cst_35 {dimension_numbers = #tpu.dot_dimension_numbers<[1], [0], [0], [1], [0, 0, 1, 1], [], []>} : vector<4x4xf32>, vector<4x256xf32>, vector<4x256xf32> -> vector<4x256xf32>
    %89 = arith.addf %84, %88 : vector<4x256xf32>
    %90 = vector.extract_strided_slice %0 {offsets = [5, 0], sizes = [1, 256], strides = [1, 1]} : vector<9x256xf32> to vector<1x256xf32>
    %91 = vector.broadcast %90 : vector<1x256xf32> to vector<4x256xf32>
    %92 = arith.mulf %89, %91 : vector<4x256xf32>
    %93 = arith.addf %78, %92 : vector<4x256xf32>
    %cst_36 = arith.constant 0.000000e+00 : f32
    %94 = vector.broadcast %cst_36 : f32 to vector<4x256xf32>
    %c241_i32 = arith.constant 241 : i32
    %95 = tpu.dynamic_rotate %2 by %c241_i32 dim 1 : vector<4x256xf32>, i32 -> vector<4x256xf32>
    %96 = vector.extract_strided_slice %7 {offsets = [6, 0, 0], sizes = [1, 4, 4], strides = [1, 1, 1]} : vector<9x4x8xf32> to vector<1x4x4xf32>
    %97 = vector.shape_cast %96 : vector<1x4x4xf32> to vector<4x4xf32>
    %cst_37 = arith.constant dense<0.000000e+00> : vector<4x256xf32>
    %98 = tpu.matmul %97, %95, %cst_37 {dimension_numbers = #tpu.dot_dimension_numbers<[1], [0], [0], [1], [0, 0, 1, 1], [], []>} : vector<4x4xf32>, vector<4x256xf32>, vector<4x256xf32> -> vector<4x256xf32>
    %99 = arith.addf %94, %98 : vector<4x256xf32>
    %c241_i32_38 = arith.constant 241 : i32
    %100 = tpu.dynamic_rotate %6 by %c241_i32_38 dim 1 : vector<4x256xf32>, i32 -> vector<4x256xf32>
    %101 = vector.extract_strided_slice %7 {offsets = [6, 0, 4], sizes = [1, 4, 4], strides = [1, 1, 1]} : vector<9x4x8xf32> to vector<1x4x4xf32>
    %102 = vector.shape_cast %101 : vector<1x4x4xf32> to vector<4x4xf32>
    %cst_39 = arith.constant dense<0.000000e+00> : vector<4x256xf32>
    %103 = tpu.matmul %102, %100, %cst_39 {dimension_numbers = #tpu.dot_dimension_numbers<[1], [0], [0], [1], [0, 0, 1, 1], [], []>} : vector<4x4xf32>, vector<4x256xf32>, vector<4x256xf32> -> vector<4x256xf32>
    %104 = arith.addf %99, %103 : vector<4x256xf32>
    %105 = vector.extract_strided_slice %0 {offsets = [6, 0], sizes = [1, 256], strides = [1, 1]} : vector<9x256xf32> to vector<1x256xf32>
    %106 = vector.broadcast %105 : vector<1x256xf32> to vector<4x256xf32>
    %107 = arith.mulf %104, %106 : vector<4x256xf32>
    %108 = arith.addf %93, %107 : vector<4x256xf32>
    %cst_40 = arith.constant 0.000000e+00 : f32
    %109 = vector.broadcast %cst_40 : f32 to vector<4x256xf32>
    %c240_i32 = arith.constant 240 : i32
    %110 = tpu.dynamic_rotate %2 by %c240_i32 dim 1 : vector<4x256xf32>, i32 -> vector<4x256xf32>
    %111 = vector.extract_strided_slice %7 {offsets = [7, 0, 0], sizes = [1, 4, 4], strides = [1, 1, 1]} : vector<9x4x8xf32> to vector<1x4x4xf32>
    %112 = vector.shape_cast %111 : vector<1x4x4xf32> to vector<4x4xf32>
    %cst_41 = arith.constant dense<0.000000e+00> : vector<4x256xf32>
    %113 = tpu.matmul %112, %110, %cst_41 {dimension_numbers = #tpu.dot_dimension_numbers<[1], [0], [0], [1], [0, 0, 1, 1], [], []>} : vector<4x4xf32>, vector<4x256xf32>, vector<4x256xf32> -> vector<4x256xf32>
    %114 = arith.addf %109, %113 : vector<4x256xf32>
    %c240_i32_42 = arith.constant 240 : i32
    %115 = tpu.dynamic_rotate %6 by %c240_i32_42 dim 1 : vector<4x256xf32>, i32 -> vector<4x256xf32>
    %116 = vector.extract_strided_slice %7 {offsets = [7, 0, 4], sizes = [1, 4, 4], strides = [1, 1, 1]} : vector<9x4x8xf32> to vector<1x4x4xf32>
    %117 = vector.shape_cast %116 : vector<1x4x4xf32> to vector<4x4xf32>
    %cst_43 = arith.constant dense<0.000000e+00> : vector<4x256xf32>
    %118 = tpu.matmul %117, %115, %cst_43 {dimension_numbers = #tpu.dot_dimension_numbers<[1], [0], [0], [1], [0, 0, 1, 1], [], []>} : vector<4x4xf32>, vector<4x256xf32>, vector<4x256xf32> -> vector<4x256xf32>
    %119 = arith.addf %114, %118 : vector<4x256xf32>
    %120 = vector.extract_strided_slice %0 {offsets = [7, 0], sizes = [1, 256], strides = [1, 1]} : vector<9x256xf32> to vector<1x256xf32>
    %121 = vector.broadcast %120 : vector<1x256xf32> to vector<4x256xf32>
    %122 = arith.mulf %119, %121 : vector<4x256xf32>
    %123 = arith.addf %108, %122 : vector<4x256xf32>
    %cst_44 = arith.constant 0.000000e+00 : f32
    %124 = vector.broadcast %cst_44 : f32 to vector<4x256xf32>
    %c239_i32 = arith.constant 239 : i32
    %125 = tpu.dynamic_rotate %2 by %c239_i32 dim 1 : vector<4x256xf32>, i32 -> vector<4x256xf32>
    %126 = vector.extract_strided_slice %7 {offsets = [8, 0, 0], sizes = [1, 4, 4], strides = [1, 1, 1]} : vector<9x4x8xf32> to vector<1x4x4xf32>
    %127 = vector.shape_cast %126 : vector<1x4x4xf32> to vector<4x4xf32>
    %cst_45 = arith.constant dense<0.000000e+00> : vector<4x256xf32>
    %128 = tpu.matmul %127, %125, %cst_45 {dimension_numbers = #tpu.dot_dimension_numbers<[1], [0], [0], [1], [0, 0, 1, 1], [], []>} : vector<4x4xf32>, vector<4x256xf32>, vector<4x256xf32> -> vector<4x256xf32>
    %129 = arith.addf %124, %128 : vector<4x256xf32>
    %c239_i32_46 = arith.constant 239 : i32
    %130 = tpu.dynamic_rotate %6 by %c239_i32_46 dim 1 : vector<4x256xf32>, i32 -> vector<4x256xf32>
    %131 = vector.extract_strided_slice %7 {offsets = [8, 0, 4], sizes = [1, 4, 4], strides = [1, 1, 1]} : vector<9x4x8xf32> to vector<1x4x4xf32>
    %132 = vector.shape_cast %131 : vector<1x4x4xf32> to vector<4x4xf32>
    %cst_47 = arith.constant dense<0.000000e+00> : vector<4x256xf32>
    %133 = tpu.matmul %132, %130, %cst_47 {dimension_numbers = #tpu.dot_dimension_numbers<[1], [0], [0], [1], [0, 0, 1, 1], [], []>} : vector<4x4xf32>, vector<4x256xf32>, vector<4x256xf32> -> vector<4x256xf32>
    %134 = arith.addf %129, %133 : vector<4x256xf32>
    %135 = vector.extract_strided_slice %0 {offsets = [8, 0], sizes = [1, 256], strides = [1, 1]} : vector<9x256xf32> to vector<1x256xf32>
    %136 = vector.broadcast %135 : vector<1x256xf32> to vector<4x256xf32>
    %137 = arith.mulf %134, %136 : vector<4x256xf32>
    %138 = arith.addf %123, %137 : vector<4x256xf32>
    %c0_48 = arith.constant 0 : index
    %c0_49 = arith.constant 0 : index
    %139 = vector.load %arg6[%c0_48, %c0_49] : memref<4x1xf32, #tpu.memory_space<vmem>>, vector<4x1xf32>
    %140 = vector.broadcast %139 : vector<4x1xf32> to vector<4x256xf32>
    %141 = arith.mulf %138, %140 : vector<4x256xf32>
    %c0_50 = arith.constant 0 : index
    %c0_51 = arith.constant 0 : index
    %142 = vector.load %arg7[%c0_50, %c0_51] : memref<4x1xf32, #tpu.memory_space<vmem>>, vector<4x1xf32>
    %143 = vector.broadcast %142 : vector<4x1xf32> to vector<4x256xf32>
    %144 = arith.addf %141, %143 : vector<4x256xf32>
    %cst_52 = arith.constant 0.000000e+00 : f32
    %145 = vector.broadcast %cst_52 : f32 to vector<4x256xf32>
    %146 = arith.maximumf %144, %145 : vector<4x256xf32>
    %c0_53 = arith.constant 0 : index
    %c0_54 = arith.constant 0 : index
    %c0_55 = arith.constant 0 : index
    %147 = vector.load %arg8[%c0_53, %c0_54, %c0_55] : memref<9x4x4xf32, #tpu.memory_space<vmem>>, vector<9x4x4xf32>
    %cst_56 = arith.constant 0.000000e+00 : f32
    %148 = vector.broadcast %cst_56 : f32 to vector<4x256xf32>
    %cst_57 = arith.constant 0.000000e+00 : f32
    %149 = vector.broadcast %cst_57 : f32 to vector<4x256xf32>
    %c17_i32_58 = arith.constant 17 : i32
    %150 = tpu.dynamic_rotate %146 by %c17_i32_58 dim 1 : vector<4x256xf32>, i32 -> vector<4x256xf32>
    %151 = vector.extract_strided_slice %147 {offsets = [0, 0, 0], sizes = [1, 4, 4], strides = [1, 1, 1]} : vector<9x4x4xf32> to vector<1x4x4xf32>
    %152 = vector.shape_cast %151 : vector<1x4x4xf32> to vector<4x4xf32>
    %cst_59 = arith.constant dense<0.000000e+00> : vector<4x256xf32>
    %153 = tpu.matmul %152, %150, %cst_59 {dimension_numbers = #tpu.dot_dimension_numbers<[1], [0], [0], [1], [0, 0, 1, 1], [], []>} : vector<4x4xf32>, vector<4x256xf32>, vector<4x256xf32> -> vector<4x256xf32>
    %154 = arith.addf %149, %153 : vector<4x256xf32>
    %155 = vector.extract_strided_slice %0 {offsets = [0, 0], sizes = [1, 256], strides = [1, 1]} : vector<9x256xf32> to vector<1x256xf32>
    %156 = vector.broadcast %155 : vector<1x256xf32> to vector<4x256xf32>
    %157 = arith.mulf %154, %156 : vector<4x256xf32>
    %158 = arith.addf %148, %157 : vector<4x256xf32>
    %cst_60 = arith.constant 0.000000e+00 : f32
    %159 = vector.broadcast %cst_60 : f32 to vector<4x256xf32>
    %c16_i32_61 = arith.constant 16 : i32
    %160 = tpu.dynamic_rotate %146 by %c16_i32_61 dim 1 : vector<4x256xf32>, i32 -> vector<4x256xf32>
    %161 = vector.extract_strided_slice %147 {offsets = [1, 0, 0], sizes = [1, 4, 4], strides = [1, 1, 1]} : vector<9x4x4xf32> to vector<1x4x4xf32>
    %162 = vector.shape_cast %161 : vector<1x4x4xf32> to vector<4x4xf32>
    %cst_62 = arith.constant dense<0.000000e+00> : vector<4x256xf32>
    %163 = tpu.matmul %162, %160, %cst_62 {dimension_numbers = #tpu.dot_dimension_numbers<[1], [0], [0], [1], [0, 0, 1, 1], [], []>} : vector<4x4xf32>, vector<4x256xf32>, vector<4x256xf32> -> vector<4x256xf32>
    %164 = arith.addf %159, %163 : vector<4x256xf32>
    %165 = vector.extract_strided_slice %0 {offsets = [1, 0], sizes = [1, 256], strides = [1, 1]} : vector<9x256xf32> to vector<1x256xf32>
    %166 = vector.broadcast %165 : vector<1x256xf32> to vector<4x256xf32>
    %167 = arith.mulf %164, %166 : vector<4x256xf32>
    %168 = arith.addf %158, %167 : vector<4x256xf32>
    %cst_63 = arith.constant 0.000000e+00 : f32
    %169 = vector.broadcast %cst_63 : f32 to vector<4x256xf32>
    %c15_i32_64 = arith.constant 15 : i32
    %170 = tpu.dynamic_rotate %146 by %c15_i32_64 dim 1 : vector<4x256xf32>, i32 -> vector<4x256xf32>
    %171 = vector.extract_strided_slice %147 {offsets = [2, 0, 0], sizes = [1, 4, 4], strides = [1, 1, 1]} : vector<9x4x4xf32> to vector<1x4x4xf32>
    %172 = vector.shape_cast %171 : vector<1x4x4xf32> to vector<4x4xf32>
    %cst_65 = arith.constant dense<0.000000e+00> : vector<4x256xf32>
    %173 = tpu.matmul %172, %170, %cst_65 {dimension_numbers = #tpu.dot_dimension_numbers<[1], [0], [0], [1], [0, 0, 1, 1], [], []>} : vector<4x4xf32>, vector<4x256xf32>, vector<4x256xf32> -> vector<4x256xf32>
    %174 = arith.addf %169, %173 : vector<4x256xf32>
    %175 = vector.extract_strided_slice %0 {offsets = [2, 0], sizes = [1, 256], strides = [1, 1]} : vector<9x256xf32> to vector<1x256xf32>
    %176 = vector.broadcast %175 : vector<1x256xf32> to vector<4x256xf32>
    %177 = arith.mulf %174, %176 : vector<4x256xf32>
    %178 = arith.addf %168, %177 : vector<4x256xf32>
    %cst_66 = arith.constant 0.000000e+00 : f32
    %179 = vector.broadcast %cst_66 : f32 to vector<4x256xf32>
    %c1_i32_67 = arith.constant 1 : i32
    %180 = tpu.dynamic_rotate %146 by %c1_i32_67 dim 1 : vector<4x256xf32>, i32 -> vector<4x256xf32>
    %181 = vector.extract_strided_slice %147 {offsets = [3, 0, 0], sizes = [1, 4, 4], strides = [1, 1, 1]} : vector<9x4x4xf32> to vector<1x4x4xf32>
    %182 = vector.shape_cast %181 : vector<1x4x4xf32> to vector<4x4xf32>
    %cst_68 = arith.constant dense<0.000000e+00> : vector<4x256xf32>
    %183 = tpu.matmul %182, %180, %cst_68 {dimension_numbers = #tpu.dot_dimension_numbers<[1], [0], [0], [1], [0, 0, 1, 1], [], []>} : vector<4x4xf32>, vector<4x256xf32>, vector<4x256xf32> -> vector<4x256xf32>
    %184 = arith.addf %179, %183 : vector<4x256xf32>
    %185 = vector.extract_strided_slice %0 {offsets = [3, 0], sizes = [1, 256], strides = [1, 1]} : vector<9x256xf32> to vector<1x256xf32>
    %186 = vector.broadcast %185 : vector<1x256xf32> to vector<4x256xf32>
    %187 = arith.mulf %184, %186 : vector<4x256xf32>
    %188 = arith.addf %178, %187 : vector<4x256xf32>
    %cst_69 = arith.constant 0.000000e+00 : f32
    %189 = vector.broadcast %cst_69 : f32 to vector<4x256xf32>
    %190 = vector.extract_strided_slice %147 {offsets = [4, 0, 0], sizes = [1, 4, 4], strides = [1, 1, 1]} : vector<9x4x4xf32> to vector<1x4x4xf32>
    %191 = vector.shape_cast %190 : vector<1x4x4xf32> to vector<4x4xf32>
    %cst_70 = arith.constant dense<0.000000e+00> : vector<4x256xf32>
    %192 = tpu.matmul %191, %146, %cst_70 {dimension_numbers = #tpu.dot_dimension_numbers<[1], [0], [0], [1], [0, 0, 1, 1], [], []>} : vector<4x4xf32>, vector<4x256xf32>, vector<4x256xf32> -> vector<4x256xf32>
    %193 = arith.addf %189, %192 : vector<4x256xf32>
    %194 = arith.addf %188, %193 : vector<4x256xf32>
    %cst_71 = arith.constant 0.000000e+00 : f32
    %195 = vector.broadcast %cst_71 : f32 to vector<4x256xf32>
    %c255_i32_72 = arith.constant 255 : i32
    %196 = tpu.dynamic_rotate %146 by %c255_i32_72 dim 1 : vector<4x256xf32>, i32 -> vector<4x256xf32>
    %197 = vector.extract_strided_slice %147 {offsets = [5, 0, 0], sizes = [1, 4, 4], strides = [1, 1, 1]} : vector<9x4x4xf32> to vector<1x4x4xf32>
    %198 = vector.shape_cast %197 : vector<1x4x4xf32> to vector<4x4xf32>
    %cst_73 = arith.constant dense<0.000000e+00> : vector<4x256xf32>
    %199 = tpu.matmul %198, %196, %cst_73 {dimension_numbers = #tpu.dot_dimension_numbers<[1], [0], [0], [1], [0, 0, 1, 1], [], []>} : vector<4x4xf32>, vector<4x256xf32>, vector<4x256xf32> -> vector<4x256xf32>
    %200 = arith.addf %195, %199 : vector<4x256xf32>
    %201 = vector.extract_strided_slice %0 {offsets = [5, 0], sizes = [1, 256], strides = [1, 1]} : vector<9x256xf32> to vector<1x256xf32>
    %202 = vector.broadcast %201 : vector<1x256xf32> to vector<4x256xf32>
    %203 = arith.mulf %200, %202 : vector<4x256xf32>
    %204 = arith.addf %194, %203 : vector<4x256xf32>
    %cst_74 = arith.constant 0.000000e+00 : f32
    %205 = vector.broadcast %cst_74 : f32 to vector<4x256xf32>
    %c241_i32_75 = arith.constant 241 : i32
    %206 = tpu.dynamic_rotate %146 by %c241_i32_75 dim 1 : vector<4x256xf32>, i32 -> vector<4x256xf32>
    %207 = vector.extract_strided_slice %147 {offsets = [6, 0, 0], sizes = [1, 4, 4], strides = [1, 1, 1]} : vector<9x4x4xf32> to vector<1x4x4xf32>
    %208 = vector.shape_cast %207 : vector<1x4x4xf32> to vector<4x4xf32>
    %cst_76 = arith.constant dense<0.000000e+00> : vector<4x256xf32>
    %209 = tpu.matmul %208, %206, %cst_76 {dimension_numbers = #tpu.dot_dimension_numbers<[1], [0], [0], [1], [0, 0, 1, 1], [], []>} : vector<4x4xf32>, vector<4x256xf32>, vector<4x256xf32> -> vector<4x256xf32>
    %210 = arith.addf %205, %209 : vector<4x256xf32>
    %211 = vector.extract_strided_slice %0 {offsets = [6, 0], sizes = [1, 256], strides = [1, 1]} : vector<9x256xf32> to vector<1x256xf32>
    %212 = vector.broadcast %211 : vector<1x256xf32> to vector<4x256xf32>
    %213 = arith.mulf %210, %212 : vector<4x256xf32>
    %214 = arith.addf %204, %213 : vector<4x256xf32>
    %cst_77 = arith.constant 0.000000e+00 : f32
    %215 = vector.broadcast %cst_77 : f32 to vector<4x256xf32>
    %c240_i32_78 = arith.constant 240 : i32
    %216 = tpu.dynamic_rotate %146 by %c240_i32_78 dim 1 : vector<4x256xf32>, i32 -> vector<4x256xf32>
    %217 = vector.extract_strided_slice %147 {offsets = [7, 0, 0], sizes = [1, 4, 4], strides = [1, 1, 1]} : vector<9x4x4xf32> to vector<1x4x4xf32>
    %218 = vector.shape_cast %217 : vector<1x4x4xf32> to vector<4x4xf32>
    %cst_79 = arith.constant dense<0.000000e+00> : vector<4x256xf32>
    %219 = tpu.matmul %218, %216, %cst_79 {dimension_numbers = #tpu.dot_dimension_numbers<[1], [0], [0], [1], [0, 0, 1, 1], [], []>} : vector<4x4xf32>, vector<4x256xf32>, vector<4x256xf32> -> vector<4x256xf32>
    %220 = arith.addf %215, %219 : vector<4x256xf32>
    %221 = vector.extract_strided_slice %0 {offsets = [7, 0], sizes = [1, 256], strides = [1, 1]} : vector<9x256xf32> to vector<1x256xf32>
    %222 = vector.broadcast %221 : vector<1x256xf32> to vector<4x256xf32>
    %223 = arith.mulf %220, %222 : vector<4x256xf32>
    %224 = arith.addf %214, %223 : vector<4x256xf32>
    %cst_80 = arith.constant 0.000000e+00 : f32
    %225 = vector.broadcast %cst_80 : f32 to vector<4x256xf32>
    %c239_i32_81 = arith.constant 239 : i32
    %226 = tpu.dynamic_rotate %146 by %c239_i32_81 dim 1 : vector<4x256xf32>, i32 -> vector<4x256xf32>
    %227 = vector.extract_strided_slice %147 {offsets = [8, 0, 0], sizes = [1, 4, 4], strides = [1, 1, 1]} : vector<9x4x4xf32> to vector<1x4x4xf32>
    %228 = vector.shape_cast %227 : vector<1x4x4xf32> to vector<4x4xf32>
    %cst_82 = arith.constant dense<0.000000e+00> : vector<4x256xf32>
    %229 = tpu.matmul %228, %226, %cst_82 {dimension_numbers = #tpu.dot_dimension_numbers<[1], [0], [0], [1], [0, 0, 1, 1], [], []>} : vector<4x4xf32>, vector<4x256xf32>, vector<4x256xf32> -> vector<4x256xf32>
    %230 = arith.addf %225, %229 : vector<4x256xf32>
    %231 = vector.extract_strided_slice %0 {offsets = [8, 0], sizes = [1, 256], strides = [1, 1]} : vector<9x256xf32> to vector<1x256xf32>
    %232 = vector.broadcast %231 : vector<1x256xf32> to vector<4x256xf32>
    %233 = arith.mulf %230, %232 : vector<4x256xf32>
    %234 = arith.addf %224, %233 : vector<4x256xf32>
    %c0_83 = arith.constant 0 : index
    %c0_84 = arith.constant 0 : index
    %235 = vector.load %arg9[%c0_83, %c0_84] : memref<4x1xf32, #tpu.memory_space<vmem>>, vector<4x1xf32>
    %236 = vector.broadcast %235 : vector<4x1xf32> to vector<4x256xf32>
    %237 = arith.mulf %234, %236 : vector<4x256xf32>
    %c0_85 = arith.constant 0 : index
    %c0_86 = arith.constant 0 : index
    %238 = vector.load %arg10[%c0_85, %c0_86] : memref<4x1xf32, #tpu.memory_space<vmem>>, vector<4x1xf32>
    %239 = vector.broadcast %238 : vector<4x1xf32> to vector<4x256xf32>
    %240 = arith.addf %237, %239 : vector<4x256xf32>
    %cst_87 = arith.constant 0.000000e+00 : f32
    %241 = vector.broadcast %cst_87 : f32 to vector<4x256xf32>
    %242 = arith.maximumf %240, %241 : vector<4x256xf32>
    %c0_88 = arith.constant 0 : index
    %c0_89 = arith.constant 0 : index
    %c0_90 = arith.constant 0 : index
    %243 = vector.load %arg11[%c0_88, %c0_89, %c0_90] : memref<1x4x256xf32, #tpu.memory_space<vmem>>, vector<1x4x256xf32>
    %244 = vector.shape_cast %243 : vector<1x4x256xf32> to vector<4x256xf32>
    %245 = vector.shape_cast %242 : vector<4x256xf32> to vector<1x4x256xf32>
    tpu.vector_store %arg11[%c0_88, %c0_89, %c0_90], %245 {strides = array<i32>} : memref<1x4x256xf32, #tpu.memory_space<vmem>>, vector<1x4x256xf32>,
    return
  }
  func.func @transform_0(%arg0: i32) -> (i32, i32, i32) {
    %c0_i32 = arith.constant 0 : i32
    %c0_i32_0 = arith.constant 0 : i32
    %c0_i32_1 = arith.constant 0 : i32
    return %arg0, %c0_i32, %c0_i32_0 : i32, i32, i32
  }
  func.func @transform_1(%arg0: i32) -> (i32, i32, i32) {
    %c0_i32 = arith.constant 0 : i32
    %c0_i32_0 = arith.constant 0 : i32
    %c0_i32_1 = arith.constant 0 : i32
    return %arg0, %c0_i32, %c0_i32_0 : i32, i32, i32
  }
  func.func @transform_2(%arg0: i32) -> (i32, i32) {
    %c0_i32 = arith.constant 0 : i32
    %c0_i32_0 = arith.constant 0 : i32
    %c0_i32_1 = arith.constant 0 : i32
    return %c0_i32, %c0_i32_0 : i32, i32
  }
  func.func @transform_3(%arg0: i32) -> (i32, i32) {
    %c0_i32 = arith.constant 0 : i32
    %c0_i32_0 = arith.constant 0 : i32
    %c0_i32_1 = arith.constant 0 : i32
    return %c0_i32, %c0_i32_0 : i32, i32
  }
  func.func @transform_4(%arg0: i32) -> (i32, i32, i32) {
    %c0_i32 = arith.constant 0 : i32
    %c0_i32_0 = arith.constant 0 : i32
    %c0_i32_1 = arith.constant 0 : i32
    %c0_i32_2 = arith.constant 0 : i32
    return %c0_i32, %c0_i32_0, %c0_i32_1 : i32, i32, i32
  }
  func.func @transform_5(%arg0: i32) -> (i32, i32) {
    %c0_i32 = arith.constant 0 : i32
    %c0_i32_0 = arith.constant 0 : i32
    %c0_i32_1 = arith.constant 0 : i32
    return %c0_i32, %c0_i32_0 : i32, i32
  }
  func.func @transform_6(%arg0: i32) -> (i32, i32) {
    %c0_i32 = arith.constant 0 : i32
    %c0_i32_0 = arith.constant 0 : i32
    %c0_i32_1 = arith.constant 0 : i32
    return %c0_i32, %c0_i32_0 : i32, i32
  }
  func.func @transform_7(%arg0: i32) -> (i32, i32, i32) {
    %c0_i32 = arith.constant 0 : i32
    %c0_i32_0 = arith.constant 0 : i32
    %c0_i32_1 = arith.constant 0 : i32
    %c0_i32_2 = arith.constant 0 : i32
    return %c0_i32, %c0_i32_0, %c0_i32_1 : i32, i32, i32
  }
  func.func @transform_8(%arg0: i32) -> (i32, i32) {
    %c0_i32 = arith.constant 0 : i32
    %c0_i32_0 = arith.constant 0 : i32
    %c0_i32_1 = arith.constant 0 : i32
    return %c0_i32, %c0_i32_0 : i32, i32
  }
  func.func @transform_9(%arg0: i32) -> (i32, i32) {
    %c0_i32 = arith.constant 0 : i32
    %c0_i32_0 = arith.constant 0 : i32
    %c0_i32_1 = arith.constant 0 : i32
    return %c0_i32, %c0_i32_0 : i32, i32
  }
  func.func @transform_10(%arg0: i32) -> (i32, i32, i32) {
    %c0_i32 = arith.constant 0 : i32
    %c0_i32_0 = arith.constant 0 : i32
    %c0_i32_1 = arith.constant 0 : i32
    return %arg0, %c0_i32, %c0_i32_0 : i32, i32, i32
  }
}

</mosaic_0001>

<bundles_post_ra>
// kernel: up_forward.1
= control target key start
LH: loop header
LB: loop body
LE: loop exit
PB: predicated region body
PF: predicated region fallthrough
CT: control target
= control target key end

     0   :  { %s2404_s13 = smov 0   ;;  %s3024_s0 = inlined_call_operand.vmem [shape: f32[2,4,64], index: 0, kind: input, shape index: {}]   ;;  %s3025_s1 = inlined_call_operand.vmem [shape: f32[2,4,256], index: 1, kind: input, shape index: {}]   ;;  %s3026_s2 = inlined_call_operand.vmem [shape: f32[64,256], index: 2, kind: input, shape index: {}]   ;;  %s3027_s3 = inlined_call_operand.vmem [shape: f32[9,256], index: 3, kind: input, shape index: {}]   ;;  %s3028_s4 = inlined_call_operand.vmem [shape: f32[9,4,8], index: 4, kind: input, shape index: {}]   ;;  %s3029_s5 = inlined_call_operand.vmem [shape: f32[4,1], index: 5, kind: input, shape index: {}]   ;;  %s3030_s6 = inlined_call_operand.vmem [shape: f32[4,1], index: 6, kind: input, shape index: {}]   ;;  %s3031_s7 = inlined_call_operand.vmem [shape: f32[9,4,4], index: 7, kind: input, shape index: {}]   ;;  %s3032_s8 = inlined_call_operand.vmem [shape: f32[4,1], index: 8, kind: input, shape index: {}]   ;;  %s3033_s9 = inlined_call_operand.vmem [shape: f32[4,1], index: 9, kind: input, shape index: {}]   ;;  %s3034_s10 = inlined_call_operand.vmem [shape: f32[2,4,256], index: 10, kind: output, shape index: {}]  }
   0x1 LB: > { %s2184_s14 = sadd.s32 4294967295, %s2337_s13   ;;  %p2188_p0 = scmp.ge.s32.totalorder %s2337_s13, 1  ;;  %s2337_s13 = sphi %s2404_s13, %s20_s13  }
   0x2   : > { %p321_p1 = scmp.lt.s32.totalorder %s2337_s13, 3 }
   0x4   : > { %p322_p2 = pnand %p2188_p0, %p321_p1 }
   0x5   : > { %p363_p3 = scmp.lt.s32.totalorder (!%p322_p2), %s2184_s14, 1  ;;  %s2339_s26 = smov (!%p322_p2), 124  }
   0x6   : > { %325 = sbr.rel (%p322_p2) target bundleno = 797 (0x31d), region = 60  ;;  %s2341_s12 = smov (!%p322_p2), 16  }
   0x7   : > { %s2342_s15 = smov (!%p322_p2), 15   ;;  %s2344_s17 = smov (!%p322_p2), 127  }
   0x8   : > { %s2345_s25 = smov (!%p322_p2), 113   ;;  %s2346_s27 = smov (!%p322_p2), 112  }
   0x9   : > { %s2347_s28 = smov (!%p322_p2), 111  }
   0xb   : > { %v397_v0 = vld [vmem:[%s3026_s2 + $0x70] sm:$0xff]  ;;  %v395_v1 = vld [vmem:[%s3026_s2 + $0x60] sm:$0xff]  ;;  %v398_v2 = vld [vmem:[%s3026_s2 + $0x78] sm:$0xff]  ;;  %s3036_s14 = smov (!%p363_p3, %s2184_s14), 1  ;;  %vm399_vm0 = vcmask 523264   ;;  %v462_v51 = vlaneseq  ;;  %vm479_vm2 = vcmask 1043456  }
   0xc   : > { %411 = vmatpush.msra.mxu0 %v397_v0  ;;  %v393_v3 = vld [vmem:[%s3026_s2 + $0x50] sm:$0xff]  ;;  %431 = vmatpush.msra.mxu1 %v398_v2  ;;  %v396_v4 = vld [vmem:[%s3026_s2 + $0x68] sm:$0xff]  ;;  %v394_v5 = vld [vmem:[%s3026_s2 + $0x58] sm:$0xff]  ;;  %s2306_s29 = sshll.u32 %s3036_s14, 3  ;;  %s2189_s23 = sshll.u32 %s3036_s14, 2  ;;  %vm476_vm5 = vcmask 31744  }
   0xd   : > { %v391_v6 = vld [vmem:[%s3026_s2 + $0x40] sm:$0xff]  ;;  %v392_v7 = vld [vmem:[%s3026_s2 + $0x48] sm:$0xff]  ;;  %s371_s16 = scalar_lea.vmem %s3025_s1, %s2306_s29  ;;  %v389_v10 = vld [vmem:[%s3026_s2 + $0x30] sm:$0xff]  ;;  %s366_s20 = scalar_lea.vmem %s3024_s0, %s2189_s23  ;;  %v2596_v53 = vand.u32 127, %v462_v51 }
   0xe   : > { %412 = vmatpush.msra.mxu0 %v395_v1  ;;  %432 = vmatpush.msra.mxu1 %v396_v4  ;;  %v2447_v8 = vld [vmem:[%s3028_s4] sm:$0xf]  ;;  %v2452_v9 = vld [vmem:[%s3028_s4 + $0xc] sm:$0xf]  ;;  %v390_v12 = vld [vmem:[%s3026_s2 + $0x38] sm:$0xff]  ;;  %s2340_s23 = smov 17  }
   0xf   : > { %v2458_v11 = vld [vmem:[%s371_s16] sm:$0xff]  ;;  %474 = vrot.lane.b32.xlu1 %v2447_v8, %s2339_s26  ;;  %845 = vrot.lane.b32.xlu2 %v2452_v9, %s2339_s26  ;;  %v2471_v13 = vld [vmem:[%s3028_s4 + $0x8] sm:$0xf]  ;;  %s2343_s16 = smov 1   ;;  %vm712_vm1 = vcmp.lt.s32.totalorder %v2596_v53, 15  ;;  %vm589_vm3 = vcmp.lt.s32.totalorder %v2596_v53, 16 }
  0x10   : > { %413 = vmatpush.msra.mxu0 %v393_v3  ;;  %433 = vmatpush.msra.mxu1 %v394_v5  ;;  %453 = vst [vmem:[#allocation1] ss:$2 sm:$0xff] %v2458_v11  ;;  %v387_v14 = vld [vmem:[%s3026_s2 + $0x20] sm:$0xff]  ;;  %v388_v15 = vld [vmem:[%s3026_s2 + $0x28] sm:$0xff]  ;;  %v385_v16 = vld [vmem:[%s3026_s2 + $0x10] sm:$0xff]  ;;  %vm464_vm4 = vcmp.lt.s32.totalorder %v2596_v53, 17 }
  0x11   : > { %722 = vrot.lane.b32.xlu0 %v2471_v13, %s2339_s26  ;;  %v386_v17 = vld [vmem:[%s3026_s2 + $0x18] sm:$0xff]  ;;  %v383_v18 = vld [vmem:[%s3026_s2] sm:$0xff]  ;;  %v384_v20 = vld [vmem:[%s3026_s2 + $0x8] sm:$0xff]  ;;  %vm835_vm6 = vcmp.lt.s32.totalorder %v2596_v53, 1  ;;  %vm1060_vm7 = vcmp.lt.s32.totalorder %v2596_v53, 127  ;;  %vm1183_vm8 = vcmp.lt.s32.totalorder %v2596_v53, 113 }
  0x12   : > { %414 = vmatpush.msra.mxu0 %v391_v6  ;;  %434 = vmatpush.msra.mxu1 %v392_v7  ;;  %v382_v19 = vld [vmem:[%s366_s20] sm:$0xf]  ;;  %v2502_v23 = vld [vmem:[%s3028_s4 + $0x4] sm:$0xf]  ;;  %v2540_v40 = vld [vmem:[%s3028_s4 + $0x10] sm:$0xf] }
  0x13   : > { %v2550_v41 = vld [vmem:[%s3028_s4 + $0x18] sm:$0xf]  ;;  %v2555_v42 = vld [vmem:[%s3028_s4 + $0x14] sm:$0xf]  ;;  %v2594_v52 = vld [vmem:[%s3028_s4 + $0x1c] sm:$0xf] }
  0x14   : > { %415 = vmatpush.msra.mxu0 %v389_v10  ;;  %435 = vmatpush.msra.mxu1 %v390_v12  ;;  %v2609_v59 = vld [vmem:[%s3028_s4 + $0x20] sm:$0xf]  ;;  %vm1306_vm9 = vcmp.lt.s32.totalorder %v2596_v53, 112  ;;  %vm1429_vm10 = vcmp.lt.s32.totalorder %v2596_v53, 111 }
  0x16   : > { %416 = vmatpush.msra.mxu0 %v387_v14  ;;  %436 = vmatpush.msra.mxu1 %v388_v15 }
  0x17   : > { %v454_v21 = vld.sshfl [vmem:[#allocation1] sm:$0xff pattern:$0x75316420]  ;;  %v455_v22 = vld.sshfl [vmem:[#allocation1 + $0x8] sm:$0xff pattern:$0x75316420] }
  0x18   : > { %417 = vmatpush.msra.mxu0 %v385_v16  ;;  %437 = vmatpush.msra.mxu1 %v386_v17  ;;  %580 = vst [vmem:[#allocation1] ss:$2 sm:$0xff] %v2458_v11 }
  0x19   : > { %458 = vrot.lane.b32.xlu1 %v454_v21, %s2340_s23  ;;  %460 = vrot.lane.b32.xlu2 %v455_v22, %s2340_s23 }
  0x1a   : > { %418 = vmatpush.msra.mxu0 %v383_v18  ;;  %438 = vmatpush.msra.mxu1 %v384_v20 }
  0x1b   : > { %2194 = vmatmul.msk.f32.vlgmr.msra.gmra.mxu0 %vm399_vm0, %v382_v19  ;;  %2195 = vmatmul.msk.f32.vlgmr.msra.gmra.mxu1 %vm399_vm0, %v382_v19 }
  0x1f   : > { %v581_v24 = vld.sshfl [vmem:[#allocation1] sm:$0xff pattern:$0x75316420]  ;;  %v582_v25 = vld.sshfl [vmem:[#allocation1 + $0x8] sm:$0xff pattern:$0x75316420] }
  0x20   : > { %703 = vst [vmem:[#allocation1] ss:$2 sm:$0xff] %v2458_v11  ;;  %587 = vrot.lane.b32.xlu0 %v582_v25, %s2341_s12 }
  0x21   : > { %599 = vrot.lane.b32.xlu1 %v2502_v23, %s2339_s26  ;;  %585 = vrot.lane.b32.xlu2 %v581_v24, %s2341_s12 }
  0x27   : > { %v704_v26 = vld.sshfl [vmem:[#allocation1] sm:$0xff pattern:$0x75316420]  ;;  %v705_v27 = vld.sshfl [vmem:[#allocation1 + $0x8] sm:$0xff pattern:$0x75316420] }
  0x28   : > { %826 = vst [vmem:[#allocation1] ss:$2 sm:$0xff] %v2458_v11 }
  0x29   : > { %708 = vrot.lane.b32.xlu1 %v704_v26, %s2342_s15  ;;  %710 = vrot.lane.b32.xlu2 %v705_v27, %s2342_s15 }
  0x2f   : > { %v828_v28 = vld.sshfl [vmem:[#allocation1 + $0x8] sm:$0xff pattern:$0x75316420]  ;;  %v827_v29 = vld.sshfl [vmem:[#allocation1] sm:$0xff pattern:$0x75316420] }
  0x30   : > { %1000 = vst [vmem:[#allocation1] ss:$2 sm:$0xff] %v2458_v11 }
  0x31   : > { %833 = vrot.lane.b32.xlu1 %v828_v28, %s2343_s16 }
  0x37   : > { %v2514_v30 = vld.sshfl [vmem:[#allocation1] sm:$0xff pattern:$0x75316420]  ;;  %v2516_v31 = vld.sshfl [vmem:[#allocation1 + $0x8] sm:$0xff pattern:$0x75316420] }
  0x38   : > { %1051 = vst [vmem:[#allocation1] ss:$2 sm:$0xff] %v2458_v11 }
  0x3f   : > { %v1052_v32 = vld.sshfl [vmem:[#allocation1] sm:$0xff pattern:$0x75316420]  ;;  %v1053_v33 = vld.sshfl [vmem:[#allocation1 + $0x8] sm:$0xff pattern:$0x75316420] }
  0x40   : > { %1174 = vst [vmem:[#allocation1] ss:$2 sm:$0xff] %v2458_v11 }
  0x47   : > { %v1175_v35 = vld.sshfl [vmem:[#allocation1] sm:$0xff pattern:$0x75316420]  ;;  %v1176_v36 = vld.sshfl [vmem:[#allocation1 + $0x8] sm:$0xff pattern:$0x75316420] }
  0x48   : > { %1297 = vst [vmem:[#allocation1] ss:$2 sm:$0xff] %v2458_v11 }
  0x4f   : > { %v1298_v38 = vld.sshfl [vmem:[#allocation1] sm:$0xff pattern:$0x75316420]  ;;  %v1299_v39 = vld.sshfl [vmem:[#allocation1 + $0x8] sm:$0xff pattern:$0x75316420] }
  0x50   : > { %1420 = vst [vmem:[#allocation1] ss:$2 sm:$0xff] %v2458_v11 }
  0x57   : > { %v1422_v47 = vld.sshfl [vmem:[#allocation1 + $0x8] sm:$0xff pattern:$0x75316420]  ;;  %v1421_v0 = vld.sshfl [vmem:[#allocation1] sm:$0xff pattern:$0x75316420] }
  0x69   : > { %v2572_v43 = vpop.permute.xlu2 %845 }
  0x73   : > { %v461_v45 = vpop.permute.xlu2 %460 }
  0x7b   : > { %v586_v49 = vpop.permute.xlu2 %585 }
  0x81   : > { %v475_v44 = vpop.permute.xlu1 %474 }
  0x83   : > { %v2584_v48 = vpop.permute.xlu0 %722  ;;  %v711_v55 = vpop.permute.xlu2 %710 }
  0x8b   : > { %v459_v46 = vpop.permute.xlu1 %458 }
  0x8c   : > { %v466_v62 = vsel %vm464_vm4, %v461_v45, %v459_v46  ;;  %v465_v63 = vsel %vm464_vm4, %v459_v46, %v461_v45 }
  0x92   : > { %v588_v54 = vpop.permute.xlu0 %587 }
  0x93   : > { %v2586_v50 = vpop.permute.xlu1 %599  ;;  %v591_v60 = vsel %vm589_vm3, %v588_v54, %v586_v49  ;;  %v590_v61 = vsel %vm589_vm3, %v586_v49, %v588_v54 }
  0x94   : > { %2208 = vmatpush.msk.msrb.mxu0 %vm479_vm2, %v591_v60  ;;  %2210 = vmatpush.msk.msrb.mxu1 %vm479_vm2, %v590_v61 }
  0x95   : > { %2209 = vmatmul.msk.f32.vlgmr.msrb.gmra.mxu0 %vm476_vm5, %v2502_v23  ;;  %2211 = vmatmul.msk.f32.vlgmr.msrb.gmra.mxu1 %vm476_vm5, %v2502_v23 }
  0x98   : > { %v2520_v34 = vpop.f32.mrf.mxu0  ;;  %v2529_v37 = vpop.f32.mrf.mxu1 }
  0x99   : > { %715 = vrot.lane.b32.xlu1 %v2520_v34, %s2342_s15  ;;  %592 = vrot.lane.b32.xlu2 %v2520_v34, %s2341_s12 }
  0x9a   : > { %467 = vrot.lane.b32.xlu0 %v2520_v34, %s2340_s23 }
  0x9b   : > { %v709_v56 = vpop.permute.xlu1 %708 }
  0x9c   : > { %v713_v57 = vsel %vm712_vm1, %v709_v56, %v711_v55  ;;  %v714_v58 = vsel %vm712_vm1, %v711_v55, %v709_v56 }
  0x9d   : > { %2216 = vmatpush.msk.msra.mxu0 %vm479_vm2, %v714_v58  ;;  %2218 = vmatpush.msk.msra.mxu1 %vm479_vm2, %v713_v57 }
  0x9e   : > { %2217 = vmatmul.msk.f32.vlgmr.msra.gmra.mxu0 %vm476_vm5, %v2471_v13  ;;  %2219 = vmatmul.msk.f32.vlgmr.msra.gmra.mxu1 %vm476_vm5, %v2471_v13 }
  0xa1   : > { %1058 = vrot.lane.b32.xlu1 %v1053_v33, %s2344_s17  ;;  %717 = vrot.lane.b32.xlu2 %v2529_v37, %s2342_s15 }
  0xa2   : > { %469 = vrot.lane.b32.xlu0 %v2529_v37, %s2340_s23 }
  0xa3   : > { %v834_v3 = vpop.permute.xlu1 %833 }
  0xa9   : > { %840 = vrot.lane.b32.xlu1 %v2529_v37, %s2343_s16  ;;  %950 = vrot.lane.b32.xlu2 %v2540_v40, %s2339_s26 }
  0xaa   : > { %831 = vrot.lane.b32.xlu0 %v827_v29, %s2343_s16 }
  0xb1   : > { %1193 = vrot.lane.b32.xlu1 %v2550_v41, %s2339_s26  ;;  %1070 = vrot.lane.b32.xlu2 %v2555_v42, %s2339_s26 }
  0xb2   : > { %594 = vrot.lane.b32.xlu0 %v2529_v37, %s2341_s12 }
  0xb9   : > { %1065 = vrot.lane.b32.xlu1 %v2529_v37, %s2344_s17  ;;  %1179 = vrot.lane.b32.xlu2 %v1175_v35, %s2345_s25 }
  0xba   : > { %1056 = vrot.lane.b32.xlu0 %v1052_v32, %s2344_s17 }
  0xc1   : > { %1302 = vrot.lane.b32.xlu1 %v1298_v38, %s2346_s27  ;;  %1186 = vrot.lane.b32.xlu2 %v2520_v34, %s2345_s25 }
  0xc2   : > { %838 = vrot.lane.b32.xlu0 %v2520_v34, %s2343_s16 }
  0xc9   : > { %1309 = vrot.lane.b32.xlu1 %v2520_v34, %s2346_s27  ;;  %1311 = vrot.lane.b32.xlu2 %v2529_v37, %s2346_s27 }
  0xca   : > { %1181 = vrot.lane.b32.xlu0 %v1176_v36, %s2345_s25 }
  0xd1   : > { %1434 = vrot.lane.b32.xlu1 %v2529_v37, %s2347_s28  ;;  %1304 = vrot.lane.b32.xlu2 %v1299_v39, %s2346_s27 }
  0xd2   : > { %1063 = vrot.lane.b32.xlu0 %v2520_v34, %s2344_s17 }
  0xd9   : > { %1427 = vrot.lane.b32.xlu1 %v1422_v47, %s2347_s28  ;;  %1439 = vrot.lane.b32.xlu2 %v2609_v59, %s2339_s26 }
  0xda   : > { %1188 = vrot.lane.b32.xlu0 %v2529_v37, %s2345_s25 }
  0xe2   : > { %1316 = vrot.lane.b32.xlu0 %v2594_v52, %s2339_s26 }
  0xea   : > { %1432 = vrot.lane.b32.xlu0 %v2520_v34, %s2347_s28 }
  0xf2   : > { %1425 = vrot.lane.b32.xlu0 %v1421_v0, %s2347_s28 }
  0xf3   : > { %v593_v1 = vpop.permute.xlu2 %592 }
  0xfb   : > { %v718_v2 = vpop.permute.xlu2 %717 }
 0x103   : > { %v2637_v4 = vpop.permute.xlu2 %950 }
 0x10b   : > { %v716_v5 = vpop.permute.xlu1 %715  ;;  %v2639_v7 = vpop.permute.xlu2 %1070 }
 0x10c   : > { %v468_v6 = vpop.permute.xlu0 %467  ;;  %v720_v22 = vsel %vm712_vm1, %v718_v2, %v716_v5 }
 0x113   : > { %v1059_v10 = vpop.permute.xlu1 %1058  ;;  %v1180_v17 = vpop.permute.xlu2 %1179 }
 0x114   : > { %v470_v11 = vpop.permute.xlu0 %469 }
 0x115   : > { %v472_v12 = vsel %vm464_vm4, %v470_v11, %v468_v6  ;;  %v471_v14 = vsel %vm464_vm4, %v468_v6, %v470_v11 }
 0x116   : > { %2196 = vmatpush.msk.msra.mxu2 %vm479_vm2, %v472_v12  ;;  %2198 = vmatpush.msk.msra.mxu3 %vm479_vm2, %v471_v14 }
 0x117   : > { %2197 = vmatmul.msk.f32.vlgmr.msra.gmra.mxu2 %vm476_vm5, %v475_v44  ;;  %2199 = vmatmul.msk.f32.vlgmr.msra.gmra.mxu3 %vm476_vm5, %v475_v44  ;;  %v2348_v44 = vmov 0  }
 0x118   : > { %2200 = vmatpush.msk.msrb.mxu2 %vm479_vm2, %v466_v62  ;;  %2202 = vmatpush.msk.msrb.mxu3 %vm479_vm2, %v465_v63 }
 0x119   : > { %2327 = vset.pattern.permute.xlu0 %v2348_v44  ;;  %2326 = vset.pattern.permute.xlu2 %v2348_v44 }
 0x11a   : > { %2328 = vset.pattern.permute.xlu1 %v2348_v44 }
 0x11b   : > { %v841_v18 = vpop.permute.xlu1 %840 }
 0x11c   : > { %v832_v13 = vpop.permute.xlu0 %831 }
 0x11d   : > { %v836_v15 = vsel %vm835_vm6, %v832_v13, %v834_v3  ;;  %v837_v16 = vsel %vm835_vm6, %v834_v3, %v832_v13 }
 0x11e   : > { %2224 = vmatpush.msk.msrb.mxu0 %vm479_vm2, %v837_v16  ;;  %2226 = vmatpush.msk.msrb.mxu1 %vm479_vm2, %v836_v15 }
 0x11f   : > { %2201 = vmatmul.msk.f32.vlgmr.msrb.gmra.mxu2 %vm476_vm5, %v2447_v8  ;;  %2203 = vmatmul.msk.f32.vlgmr.msrb.gmra.mxu3 %vm476_vm5, %v2447_v8  ;;  %v719_v8 = vsel %vm712_vm1, %v716_v5, %v718_v2  ;;  %v694_v2 = vpop.f32.mrf.mxu1 }
 0x120   : > { %2232 = vmatpush.msk.msra.mxu0 %vm479_vm2, %v2514_v30  ;;  %2234 = vmatpush.msk.msra.mxu1 %vm479_vm2, %v2516_v31 }
 0x121   : > { %2225 = vmatmul.msk.f32.vlgmr.msrb.gmra.mxu0 %vm476_vm5, %v2452_v9  ;;  %2227 = vmatmul.msk.f32.vlgmr.msrb.gmra.mxu1 %vm476_vm5, %v2452_v9  ;;  %v2684_v9 = vpop.permute.xlu2 %1186 }
 0x123   : > { %v2686_v23 = vpop.permute.xlu1 %1193 }
 0x124   : > { %v595_v19 = vpop.permute.xlu0 %594 }
 0x125   : > { %v596_v20 = vsel %vm589_vm3, %v593_v1, %v595_v19  ;;  %v597_v21 = vsel %vm589_vm3, %v595_v19, %v593_v1  ;;  %v674_v1 = vpop.f32.mrf.mxu0 }
 0x126   : > { %2204 = vmatpush.msk.msra.mxu2 %vm479_vm2, %v597_v21  ;;  %2206 = vmatpush.msk.msra.mxu3 %vm479_vm2, %v596_v20 }
 0x127   : > { %2205 = vmatmul.msk.f32.vlgmr.msra.gmra.mxu2 %vm476_vm5, %v2586_v50  ;;  %2207 = vmatmul.msk.f32.vlgmr.msra.gmra.mxu3 %vm476_vm5, %v2586_v50  ;;  %v817_v6 = vpop.f32.mrf.mxu1 }
 0x128   : > { %2212 = vmatpush.msk.msrb.mxu2 %vm479_vm2, %v720_v22  ;;  %2214 = vmatpush.msk.msrb.mxu3 %vm479_vm2, %v719_v8 }
 0x129   : > { %2233 = vmatmul.msk.f32.vlgmr.msra.gmra.mxu0 %vm476_vm5, %v2540_v40  ;;  %2235 = vmatmul.msk.f32.vlgmr.msra.gmra.mxu1 %vm476_vm5, %v2540_v40  ;;  %v1312_v27 = vpop.permute.xlu2 %1311 }
 0x12b   : > { %v1066_v28 = vpop.permute.xlu1 %1065 }
 0x12c   : > { %v1057_v24 = vpop.permute.xlu0 %1056 }
 0x12d   : > { %v1061_v25 = vsel %vm1060_vm7, %v1057_v24, %v1059_v10  ;;  %v1062_v26 = vsel %vm1060_vm7, %v1059_v10, %v1057_v24  ;;  %v797_v5 = vpop.f32.mrf.mxu0 }
 0x12e   : > { %2240 = vmatpush.msk.msrb.mxu0 %vm479_vm2, %v1061_v25  ;;  %2242 = vmatpush.msk.msrb.mxu1 %vm479_vm2, %v1062_v26 }
 0x12f   : > { %2213 = vmatmul.msk.f32.vlgmr.msrb.gmra.mxu2 %vm476_vm5, %v2584_v48  ;;  %2215 = vmatmul.msk.f32.vlgmr.msrb.gmra.mxu3 %vm476_vm5, %v2584_v48 }
 0x131   : > { %2241 = vmatmul.msk.f32.vlgmr.msrb.gmra.mxu0 %vm476_vm5, %v2555_v42  ;;  %2243 = vmatmul.msk.f32.vlgmr.msrb.gmra.mxu1 %vm476_vm5, %v2555_v42  ;;  %v1305_v32 = vpop.permute.xlu2 %1304 }
 0x133   : > { %v1303_v33 = vpop.permute.xlu1 %1302 }
 0x134   : > { %v839_v29 = vpop.permute.xlu0 %838  ;;  %v1307_v39 = vsel %vm1306_vm9, %v1303_v33, %v1305_v32 }
 0x135   : > { %v842_v30 = vsel %vm835_vm6, %v839_v29, %v841_v18  ;;  %v843_v31 = vsel %vm835_vm6, %v841_v18, %v839_v29 }
 0x136   : > { %2220 = vmatpush.msk.msra.mxu2 %vm479_vm2, %v843_v31  ;;  %2222 = vmatpush.msk.msra.mxu3 %vm479_vm2, %v842_v30 }
 0x137   : > { %2221 = vmatmul.msk.f32.vlgmr.msra.gmra.mxu2 %vm476_vm5, %v2572_v43  ;;  %2223 = vmatmul.msk.f32.vlgmr.msra.gmra.mxu3 %vm476_vm5, %v2572_v43  ;;  %v1543_v43 = vld [vmem:[%s3029_s5] sm:$0xf] }
 0x138   : > { %2228 = vmatpush.msk.msrb.mxu2 %vm479_vm2, %v2520_v34  ;;  %2230 = vmatpush.msk.msrb.mxu3 %vm479_vm2, %v2529_v37  ;;  %v1308_v34 = vsel %vm1306_vm9, %v1305_v32, %v1303_v33 }
 0x139   : > { %1546 = vperm.xlu2 %2326, %v1543_v43   ;;  %v1440_v55 = vpop.permute.xlu2 %1439 }
 0x13b   : > { %v1310_v45 = vpop.permute.xlu1 %1309 }
 0x13c   : > { %v1182_v35 = vpop.permute.xlu0 %1181  ;;  %v1313_v49 = vsel %vm1306_vm9, %v1310_v45, %v1312_v27  ;;  %v1314_v50 = vsel %vm1306_vm9, %v1312_v27, %v1310_v45 }
 0x13d   : > { %v1184_v36 = vsel %vm1183_vm8, %v1180_v17, %v1182_v35  ;;  %v1185_v38 = vsel %vm1183_vm8, %v1182_v35, %v1180_v17 }
 0x13e   : > { %2248 = vmatpush.msk.msra.mxu0 %vm479_vm2, %v1184_v36  ;;  %2250 = vmatpush.msk.msra.mxu1 %vm479_vm2, %v1185_v38 }
 0x13f   : > { %2229 = vmatmul.msk.f32.vlgmr.msrb.gmra.mxu2 %vm476_vm5, %v2637_v4  ;;  %2231 = vmatmul.msk.f32.vlgmr.msrb.gmra.mxu3 %vm476_vm5, %v2637_v4 }
 0x140   : > { %2256 = vmatpush.msk.msrb.mxu0 %vm479_vm2, %v1307_v39  ;;  %2258 = vmatpush.msk.msrb.mxu1 %vm479_vm2, %v1308_v34 }
 0x141   : > { %2249 = vmatmul.msk.f32.vlgmr.msra.gmra.mxu0 %vm476_vm5, %v2550_v41  ;;  %2251 = vmatmul.msk.f32.vlgmr.msra.gmra.mxu1 %vm476_vm5, %v2550_v41  ;;  %v1551_v41 = vld [vmem:[%s3030_s6] sm:$0xf] }
 0x142   : > { %1554 = vperm.xlu0 %2327, %v1551_v41  }
 0x144   : > { %v1064_v37 = vpop.permute.xlu0 %1063 }
 0x145   : > { %v1067_v40 = vsel %vm1060_vm7, %v1064_v37, %v1066_v28  ;;  %v1068_v42 = vsel %vm1060_vm7, %v1066_v28, %v1064_v37 }
 0x146   : > { %2236 = vmatpush.msk.msra.mxu2 %vm479_vm2, %v1067_v40  ;;  %2238 = vmatpush.msk.msra.mxu3 %vm479_vm2, %v1068_v42 }
 0x147   : > { %2237 = vmatmul.msk.f32.vlgmr.msra.gmra.mxu2 %vm476_vm5, %v2639_v7  ;;  %2239 = vmatmul.msk.f32.vlgmr.msra.gmra.mxu3 %vm476_vm5, %v2639_v7 }
 0x149   : > { %2257 = vmatmul.msk.f32.vlgmr.msrb.gmra.mxu0 %vm476_vm5, %v2594_v52  ;;  %2259 = vmatmul.msk.f32.vlgmr.msrb.gmra.mxu1 %vm476_vm5, %v2594_v52  ;;  %v1435_v52 = vpop.permute.xlu1 %1434 }
 0x14c   : > { %v1189_v46 = vpop.permute.xlu0 %1188 }
 0x14d   : > { %v1190_v47 = vsel %vm1183_vm8, %v2684_v9, %v1189_v46  ;;  %v1191_v48 = vsel %vm1183_vm8, %v1189_v46, %v2684_v9  ;;  %v2807_v9 = vld [vmem:[%s3027_s3] sm:$0xff] }
 0x14e   : > { %2244 = vmatpush.msk.msrb.mxu2 %vm479_vm2, %v1190_v47  ;;  %2246 = vmatpush.msk.msrb.mxu3 %vm479_vm2, %v1191_v48  ;;  %v697_v27 = vperm.slane %v2807_v9, 1  ;;  %v574_v32 = vperm.slane %v2807_v9, 0  ;;  %v820_v35 = vperm.slane %v2807_v9, 2  ;;  %v943_v40 = vperm.slane %v2807_v9, 3 }
 0x14f   : > { %2245 = vmatmul.msk.f32.vlgmr.msrb.gmra.mxu2 %vm476_vm5, %v2686_v23  ;;  %2247 = vmatmul.msk.f32.vlgmr.msrb.gmra.mxu3 %vm476_vm5, %v2686_v23  ;;  %v2812_v23 = vld [vmem:[%s3027_s3 + $0x8] sm:$0xff] }
 0x150   : > { %2252 = vmatpush.msk.msra.mxu2 %vm479_vm2, %v1313_v49  ;;  %2254 = vmatpush.msk.msra.mxu3 %vm479_vm2, %v1314_v50  ;;  %v698_v29 = vperm.slane %v2812_v23, 1  ;;  %v575_v33 = vperm.slane %v2812_v23, 0  ;;  %v821_v36 = vperm.slane %v2812_v23, 2  ;;  %v944_v42 = vperm.slane %v2812_v23, 3 }
 0x151   : > { %v1428_v58 = vpop.permute.xlu1 %1427 }
 0x154   : > { %v1317_v51 = vpop.permute.xlu0 %1316 }
 0x157   : > { %2253 = vmatmul.msk.f32.vlgmr.msra.gmra.mxu2 %vm476_vm5, %v1317_v51  ;;  %2255 = vmatmul.msk.f32.vlgmr.msra.gmra.mxu3 %vm476_vm5, %v1317_v51 }
 0x15c   : > { %v1433_v54 = vpop.permute.xlu0 %1432 }
 0x15d   : > { %v1436_v56 = vsel %vm1429_vm10, %v1433_v54, %v1435_v52  ;;  %v1437_v57 = vsel %vm1429_vm10, %v1435_v52, %v1433_v54 }
 0x15e   : > { %2260 = vmatpush.msk.msrb.mxu2 %vm479_vm2, %v1436_v56  ;;  %2262 = vmatpush.msk.msrb.mxu3 %vm479_vm2, %v1437_v57 }
 0x15f   : > { %2261 = vmatmul.msk.f32.vlgmr.msrb.gmra.mxu2 %vm476_vm5, %v1440_v55  ;;  %2263 = vmatmul.msk.f32.vlgmr.msrb.gmra.mxu3 %vm476_vm5, %v1440_v55 }
 0x164   : > { %v1426_v60 = vpop.permute.xlu0 %1425 }
 0x165   : > { %v1430_v61 = vsel %vm1429_vm10, %v1426_v60, %v1428_v58  ;;  %v1431_v62 = vsel %vm1429_vm10, %v1428_v58, %v1426_v60  ;;  %v1168_v58 = vperm.slane %v2807_v9, 5 }
 0x166   : > { %2264 = vmatpush.msk.msra.mxu0 %vm479_vm2, %v1430_v61  ;;  %2266 = vmatpush.msk.msra.mxu1 %vm479_vm2, %v1431_v62  ;;  %v1169_v61 = vperm.slane %v2812_v23, 5 }
 0x167   : > { %2265 = vmatmul.msk.f32.vlgmr.msra.gmra.mxu0 %vm476_vm5, %v2609_v59  ;;  %2267 = vmatmul.msk.f32.vlgmr.msra.gmra.mxu1 %vm476_vm5, %v2609_v59 }
 0x19a   : > { %v503_v63 = vpop.f32.mrf.mxu2  ;;  %v523_v0 = vpop.f32.mrf.mxu3 }
 0x19e   : > { %v920_v14 = vpop.f32.mrf.mxu0  ;;  %v940_v13 = vpop.f32.mrf.mxu1 }
 0x1a2   : > { %v551_v3 = vpop.f32.mrf.mxu2  ;;  %v571_v4 = vpop.f32.mrf.mxu3 }
 0x1a3   : > { %v552_v38 = vadd.f32 %v551_v3, %v503_v63  ;;  %v572_v39 = vadd.f32 %v571_v4, %v523_v0  ;;  %v1291_v0 = vperm.slane %v2807_v9, 6 }
 0x1a5   : > { %v576_v46 = vmul.f32 %v574_v32, %v552_v38  ;;  %v577_v47 = vmul.f32 %v575_v33, %v572_v39 }
 0x1a6   : > { %v1026_v17 = vpop.f32.mrf.mxu0  ;;  %v1046_v18 = vpop.f32.mrf.mxu1 }
 0x1aa   : > { %v626_v7 = vpop.f32.mrf.mxu2  ;;  %v646_v10 = vpop.f32.mrf.mxu3 }
 0x1ab   : > { %v675_v26 = vadd.f32 %v674_v1, %v626_v7  ;;  %v695_v28 = vadd.f32 %v694_v2, %v646_v10  ;;  %v1292_v1 = vperm.slane %v2812_v23, 6 }
 0x1ad   : > { %v699_v41 = vmul.f32 %v697_v27, %v675_v26  ;;  %v700_v43 = vmul.f32 %v698_v29, %v695_v28  ;;  %v2859_v28 = vld [vmem:[%s3027_s3 + $0x10] ss:$0 sm:$0xff] }
 0x1ae   : > { %v1145_v20 = vpop.f32.mrf.mxu0  ;;  %v1165_v21 = vpop.f32.mrf.mxu1 }
 0x1af   : > { %v701_v50 = vadd.f32 %v699_v41, %v576_v46  ;;  %v702_v51 = vadd.f32 %v700_v43, %v577_v47  ;;  %v1547_v47 = vpop.permute.xlu2 %1546 }
 0x1b2   : > { %v749_v11 = vpop.f32.mrf.mxu2  ;;  %v769_v12 = vpop.f32.mrf.mxu3 }
 0x1b3   : > { %v798_v34 = vadd.f32 %v797_v5, %v749_v11  ;;  %v818_v37 = vadd.f32 %v817_v6, %v769_v12  ;;  %v1414_v12 = vperm.slane %v2807_v9, 7 }
 0x1b5   : > { %v822_v48 = vmul.f32 %v820_v35, %v798_v34  ;;  %v823_v49 = vmul.f32 %v821_v36, %v818_v37 }
 0x1b7   : > { %v824_v62 = vadd.f32 %v822_v48, %v701_v50  ;;  %v825_v63 = vadd.f32 %v823_v49, %v702_v51  ;;  %v1555_v50 = vpop.permute.xlu0 %1554 }
 0x1ba   : > { %v872_v15 = vpop.f32.mrf.mxu2  ;;  %v892_v16 = vpop.f32.mrf.mxu3 }
 0x1bb   : > { %v921_v44 = vadd.f32 %v920_v14, %v872_v15  ;;  %v941_v45 = vadd.f32 %v940_v13, %v892_v16  ;;  %v1415_v14 = vperm.slane %v2812_v23, 7 }
 0x1bd   : > { %v945_v52 = vmul.f32 %v943_v40, %v921_v44  ;;  %v946_v54 = vmul.f32 %v944_v42, %v941_v45 }
 0x1be   : > { %v1268_v24 = vpop.f32.mrf.mxu0  ;;  %v1288_v25 = vpop.f32.mrf.mxu1 }
 0x1bf   : > { %v947_v10 = vadd.f32 %v945_v52, %v824_v62  ;;  %v948_v11 = vadd.f32 %v946_v54, %v825_v63 }
 0x1c2   : > { %v977_v19 = vpop.f32.mrf.mxu2  ;;  %v997_v59 = vpop.f32.mrf.mxu3 }
 0x1c3   : > { %v1027_v4 = vadd.f32 %v1026_v17, %v977_v19  ;;  %v1047_v5 = vadd.f32 %v1046_v18, %v997_v59 }
 0x1c6   : > { %v1391_v2 = vpop.f32.mrf.mxu0  ;;  %v1411_v3 = vpop.f32.mrf.mxu1 }
 0x1ca   : > { %v1097_v8 = vpop.f32.mrf.mxu2  ;;  %v1117_v22 = vpop.f32.mrf.mxu3 }
 0x1cb   : > { %v1146_v57 = vadd.f32 %v1145_v20, %v1097_v8  ;;  %v1166_v60 = vadd.f32 %v1165_v21, %v1117_v22  ;;  %v1049_v21 = vadd.f32 %v1027_v4, %v947_v10  ;;  %v1050_v8 = vadd.f32 %v1047_v5, %v948_v11  ;;  %v1561_v4 = vld [vmem:[%s3031_s7] sm:$0xf] }
 0x1cd   : > { %v1170_v13 = vmul.f32 %v1168_v58, %v1146_v57  ;;  %v1171_v15 = vmul.f32 %v1169_v61, %v1166_v60  ;;  %v2093_v60 = vld [vmem:[%s3032_s8] sm:$0xf] }
 0x1cf   : > { %v1172_v22 = vadd.f32 %v1170_v13, %v1049_v21 }
 0x1d2   : > { %v1220_v30 = vpop.f32.mrf.mxu2  ;;  %v1240_v31 = vpop.f32.mrf.mxu3 }
 0x1d3   : > { %v1269_v6 = vadd.f32 %v1268_v24, %v1220_v30  ;;  %v1289_v7 = vadd.f32 %v1288_v25, %v1240_v31  ;;  %v1173_v24 = vadd.f32 %v1171_v15, %v1050_v8  ;;  %v2864_v30 = vld [vmem:[%s3027_s3 + $0x18] ss:$0 sm:$0xff] }
 0x1d5   : > { %v1293_v17 = vmul.f32 %v1291_v0, %v1269_v6  ;;  %v1294_v18 = vmul.f32 %v1292_v1, %v1289_v7 }
 0x1d7   : > { %v1295_v39 = vadd.f32 %v1293_v17, %v1172_v22  ;;  %v1296_v34 = vadd.f32 %v1294_v18, %v1173_v24  ;;  %v1562_v18 = vld [vmem:[%s3031_s7 + $0x4] sm:$0xf]  ;;  %v1565_v22 = vld [vmem:[%s3031_s7 + $0x10] sm:$0xf] }
 0x1da   : > { %v1343_v55 = vpop.f32.mrf.mxu2  ;;  %v1363_v56 = vpop.f32.mrf.mxu3 }
 0x1db   : > { %v1392_v16 = vadd.f32 %v1391_v2, %v1343_v55  ;;  %v1412_v20 = vadd.f32 %v1411_v3, %v1363_v56 }
 0x1dd   : > { %v1416_v25 = vmul.f32 %v1414_v12, %v1392_v16  ;;  %v1417_v26 = vmul.f32 %v1415_v14, %v1412_v20  ;;  %v1563_v16 = vld [vmem:[%s3031_s7 + $0x8] sm:$0xf]  ;;  %v2101_v20 = vld [vmem:[%s3033_s9] sm:$0xf] }
 0x1df   : > { %v1418_v43 = vadd.f32 %v1416_v25, %v1295_v39  ;;  %v1419_v44 = vadd.f32 %v1417_v26, %v1296_v34  ;;  %v1564_v39 = vld [vmem:[%s3031_s7 + $0xc] sm:$0xf] }
 0x1e2   : > { %v1466_v19 = vpop.f32.mrf.mxu2  ;;  %v1486_v59 = vpop.f32.mrf.mxu3 }
 0x1e4   : > { %v1514_v31 = vpop.f32.mrf.mxu0  ;;  %v1534_v38 = vpop.f32.mrf.mxu1 }
 0x1e5   : > { %v1515_v37 = vadd.f32 %v1514_v31, %v1466_v19  ;;  %v1535_v41 = vadd.f32 %v1534_v38, %v1486_v59 }
 0x1e7   : > { %v1539_v45 = vmul.f32 %v2859_v28, %v1515_v37  ;;  %v1540_v46 = vmul.f32 %v2864_v30, %v1535_v41 }
 0x1e9   : > { %v1541_v48 = vadd.f32 %v1539_v45, %v1418_v43  ;;  %v1542_v49 = vadd.f32 %v1540_v46, %v1419_v44  ;;  %v1567_v44 = vld [vmem:[%s3031_s7 + $0x18] sm:$0xf]  ;;  %v1566_v46 = vld [vmem:[%s3031_s7 + $0x14] sm:$0xf] }
 0x1eb   : > { %v1549_v51 = vmul.f32 %v1547_v47, %v1541_v48  ;;  %v1550_v52 = vmul.f32 %v1547_v47, %v1542_v49  ;;  %v1569_v49 = vld [vmem:[%s3031_s7 + $0x20] sm:$0xf] }
 0x1ed   : > { %v1557_v54 = vadd.f32 %v1555_v50, %v1549_v51  ;;  %v1558_v55 = vadd.f32 %v1555_v50, %v1550_v52  ;;  %v1568_v52 = vld [vmem:[%s3031_s7 + $0x1c] sm:$0xf] }
 0x1ef   : > { %v1559_v56 = vmax.f32 %v1557_v54, 0.0  ;;  %v1560_v57 = vmax.f32 %v1558_v55, 0.0 }
 0x1f1   : > { %1572 = vrot.lane.b32.xlu2 %v1560_v57, %s2340_s23  ;;  %1629 = vrot.lane.b32.xlu0 %v1559_v56, %s2341_s12 }
 0x1f2   : > { %1570 = vrot.lane.b32.xlu1 %v1559_v56, %s2340_s23 }
 0x1f9   : > { %1690 = vrot.lane.b32.xlu2 %v1560_v57, %s2342_s15  ;;  %1749 = vrot.lane.b32.xlu0 %v1560_v57, %s2343_s16 }
 0x1fa   : > { %1688 = vrot.lane.b32.xlu1 %v1559_v56, %s2342_s15 }
 0x201   : > { %1747 = vrot.lane.b32.xlu2 %v1559_v56, %s2343_s16  ;;  %1857 = vrot.lane.b32.xlu0 %v1559_v56, %s2344_s17 }
 0x202   : > { %1631 = vrot.lane.b32.xlu1 %v1560_v57, %s2341_s12 }
 0x209   : > { %1918 = vrot.lane.b32.xlu2 %v1560_v57, %s2345_s25  ;;  %2036 = vrot.lane.b32.xlu0 %v1560_v57, %s2347_s28 }
 0x20a   : > { %1916 = vrot.lane.b32.xlu1 %v1559_v56, %s2345_s25 }
 0x211   : > { %2034 = vrot.lane.b32.xlu2 %v1559_v56, %s2347_s28  ;;  %2096 = vperm.xlu0 %2327, %v2093_v60  }
 0x212   : > { %1859 = vrot.lane.b32.xlu1 %v1560_v57, %s2344_s17 }
 0x219   : > { %1977 = vrot.lane.b32.xlu2 %v1560_v57, %s2346_s27 }
 0x21a   : > { %1975 = vrot.lane.b32.xlu1 %v1559_v56, %s2346_s27  ;;  %s376_s27 = scalar_lea.vmem %s3034_s10, %s2306_s29 }
 0x222   : > { %2104 = vperm.xlu1 %2328, %v2101_v20  }
 0x24b   : > { %v1573_v62 = vpop.permute.xlu2 %1572 }
 0x253   : > { %v1691_v63 = vpop.permute.xlu2 %1690 }
 0x25b   : > { %v1748_v7 = vpop.permute.xlu2 %1747 }
 0x263   : > { %v1630_v2 = vpop.permute.xlu0 %1629  ;;  %v1919_v21 = vpop.permute.xlu2 %1918 }
 0x264   : > { %v1571_v3 = vpop.permute.xlu1 %1570 }
 0x265   : > { %v1574_v5 = vsel %vm464_vm4, %v1571_v3, %v1573_v62  ;;  %v1575_v6 = vsel %vm464_vm4, %v1573_v62, %v1571_v3 }
 0x266   : > { %2268 = vmatpush.msk.msra.mxu2 %vm479_vm2, %v1575_v6  ;;  %2270 = vmatpush.msk.msra.mxu3 %vm479_vm2, %v1574_v5 }
 0x267   : > { %2269 = vmatmul.msk.f32.vlgmr.msra.gmra.mxu2 %vm476_vm5, %v1561_v4  ;;  %2271 = vmatmul.msk.f32.vlgmr.msra.gmra.mxu3 %vm476_vm5, %v1561_v4 }
 0x26b   : > { %v1750_v10 = vpop.permute.xlu0 %1749  ;;  %v2035_v31 = vpop.permute.xlu2 %2034 }
 0x26c   : > { %v1689_v11 = vpop.permute.xlu1 %1688  ;;  %v1751_v24 = vsel %vm835_vm6, %v1748_v7, %v1750_v10  ;;  %v1752_v25 = vsel %vm835_vm6, %v1750_v10, %v1748_v7 }
 0x26d   : > { %v1692_v13 = vsel %vm712_vm1, %v1689_v11, %v1691_v63  ;;  %v1693_v15 = vsel %vm712_vm1, %v1691_v63, %v1689_v11 }
 0x26e   : > { %2276 = vmatpush.msk.msrb.mxu2 %vm479_vm2, %v1693_v15  ;;  %2278 = vmatpush.msk.msrb.mxu3 %vm479_vm2, %v1692_v13 }
 0x26f   : > { %2277 = vmatmul.msk.f32.vlgmr.msrb.gmra.mxu2 %vm476_vm5, %v1563_v16  ;;  %2279 = vmatmul.msk.f32.vlgmr.msrb.gmra.mxu3 %vm476_vm5, %v1563_v16 }
 0x270   : > { %2284 = vmatpush.msk.msra.mxu2 %vm479_vm2, %v1559_v56  ;;  %2286 = vmatpush.msk.msra.mxu3 %vm479_vm2, %v1560_v57 }
 0x273   : > { %v1858_v8 = vpop.permute.xlu0 %1857  ;;  %v1978_v50 = vpop.permute.xlu2 %1977 }
 0x274   : > { %v1632_v17 = vpop.permute.xlu1 %1631 }
 0x275   : > { %v1633_v19 = vsel %vm589_vm3, %v1630_v2, %v1632_v17  ;;  %v1634_v59 = vsel %vm589_vm3, %v1632_v17, %v1630_v2 }
 0x276   : > { %2272 = vmatpush.msk.msrb.mxu0 %vm479_vm2, %v1634_v59  ;;  %2274 = vmatpush.msk.msrb.mxu1 %vm479_vm2, %v1633_v19 }
 0x277   : > { %2273 = vmatmul.msk.f32.vlgmr.msrb.gmra.mxu0 %vm476_vm5, %v1562_v18  ;;  %2275 = vmatmul.msk.f32.vlgmr.msrb.gmra.mxu1 %vm476_vm5, %v1562_v18 }
 0x278   : > { %2280 = vmatpush.msk.msra.mxu0 %vm479_vm2, %v1752_v25  ;;  %2282 = vmatpush.msk.msra.mxu1 %vm479_vm2, %v1751_v24 }
 0x279   : > { %2285 = vmatmul.msk.f32.vlgmr.msra.gmra.mxu2 %vm476_vm5, %v1565_v22  ;;  %2287 = vmatmul.msk.f32.vlgmr.msra.gmra.mxu3 %vm476_vm5, %v1565_v22 }
 0x27b   : > { %v2037_v26 = vpop.permute.xlu0 %2036 }
 0x27c   : > { %v1917_v38 = vpop.permute.xlu1 %1916  ;;  %v2038_v34 = vsel %vm1429_vm10, %v2035_v31, %v2037_v26  ;;  %v2039_v37 = vsel %vm1429_vm10, %v2037_v26, %v2035_v31 }
 0x27d   : > { %v1920_v41 = vsel %vm1183_vm8, %v1917_v38, %v1919_v21  ;;  %v1921_v43 = vsel %vm1183_vm8, %v1919_v21, %v1917_v38 }
 0x27e   : > { %2292 = vmatpush.msk.msrb.mxu2 %vm479_vm2, %v1920_v41  ;;  %2294 = vmatpush.msk.msrb.mxu3 %vm479_vm2, %v1921_v43 }
 0x27f   : > { %2281 = vmatmul.msk.f32.vlgmr.msra.gmra.mxu0 %vm476_vm5, %v1564_v39  ;;  %2283 = vmatmul.msk.f32.vlgmr.msra.gmra.mxu1 %vm476_vm5, %v1564_v39 }
 0x280   : > { %2300 = vmatpush.msk.msra.mxu2 %vm479_vm2, %v2038_v34  ;;  %2302 = vmatpush.msk.msra.mxu3 %vm479_vm2, %v2039_v37 }
 0x281   : > { %2293 = vmatmul.msk.f32.vlgmr.msrb.gmra.mxu2 %vm476_vm5, %v1567_v44  ;;  %2295 = vmatmul.msk.f32.vlgmr.msrb.gmra.mxu3 %vm476_vm5, %v1567_v44 }
 0x284   : > { %v1860_v45 = vpop.permute.xlu1 %1859 }
 0x285   : > { %v1861_v47 = vsel %vm1060_vm7, %v1858_v8, %v1860_v45  ;;  %v1862_v48 = vsel %vm1060_vm7, %v1860_v45, %v1858_v8 }
 0x286   : > { %2288 = vmatpush.msk.msrb.mxu0 %vm479_vm2, %v1861_v47  ;;  %2290 = vmatpush.msk.msrb.mxu1 %vm479_vm2, %v1862_v48  ;;  %v2097_v47 = vpop.permute.xlu0 %2096 }
 0x287   : > { %2289 = vmatmul.msk.f32.vlgmr.msrb.gmra.mxu0 %vm476_vm5, %v1566_v46  ;;  %2291 = vmatmul.msk.f32.vlgmr.msrb.gmra.mxu1 %vm476_vm5, %v1566_v46 }
 0x289   : > { %2301 = vmatmul.msk.f32.vlgmr.msra.gmra.mxu2 %vm476_vm5, %v1569_v49  ;;  %2303 = vmatmul.msk.f32.vlgmr.msra.gmra.mxu3 %vm476_vm5, %v1569_v49 }
 0x28c   : > { %v1976_v51 = vpop.permute.xlu1 %1975 }
 0x28d   : > { %v1979_v54 = vsel %vm1306_vm9, %v1976_v51, %v1978_v50  ;;  %v1980_v55 = vsel %vm1306_vm9, %v1978_v50, %v1976_v51 }
 0x28e   : > { %2296 = vmatpush.msk.msra.mxu0 %vm479_vm2, %v1979_v54  ;;  %2298 = vmatpush.msk.msra.mxu1 %vm479_vm2, %v1980_v55 }
 0x28f   : > { %2297 = vmatmul.msk.f32.vlgmr.msra.gmra.mxu0 %vm476_vm5, %v1568_v52  ;;  %2299 = vmatmul.msk.f32.vlgmr.msra.gmra.mxu1 %vm476_vm5, %v1568_v52 }
 0x294   : > { %v2105_v48 = vpop.permute.xlu1 %2104 }
 0x2ea   : > { %v1602_v56 = vpop.f32.mrf.mxu2  ;;  %v1622_v57 = vpop.f32.mrf.mxu3 }
 0x2eb   : > { %v1625_v4 = vmul.f32 %v1602_v56, %v574_v32  ;;  %v1626_v5 = vmul.f32 %v1622_v57, %v575_v33 }
 0x2f2   : > { %v1720_v60 = vpop.f32.mrf.mxu2  ;;  %v1740_v62 = vpop.f32.mrf.mxu3 }
 0x2f3   : > { %v1743_v13 = vmul.f32 %v1720_v60, %v820_v35  ;;  %v1744_v15 = vmul.f32 %v1740_v62, %v821_v36 }
 0x2f4   : > { %v1661_v63 = vpop.f32.mrf.mxu0  ;;  %v1681_v2 = vpop.f32.mrf.mxu1 }
 0x2f5   : > { %v1684_v3 = vmul.f32 %v1661_v63, %v697_v27  ;;  %v1685_v53 = vmul.f32 %v1681_v2, %v698_v29 }
 0x2f7   : > { %v1686_v10 = vadd.f32 %v1684_v3, %v1625_v4  ;;  %v1687_v11 = vadd.f32 %v1685_v53, %v1626_v5 }
 0x2f9   : > { %v1745_v20 = vadd.f32 %v1743_v13, %v1686_v10  ;;  %v1746_v33 = vadd.f32 %v1744_v15, %v1687_v11 }
 0x2fc   : > { %v1779_v6 = vpop.f32.mrf.mxu0  ;;  %v1799_v7 = vpop.f32.mrf.mxu1 }
 0x2fd   : > { %v1832_v27 = vpop.f32.mrf.mxu2  ;;  %v1852_v16 = vpop.f32.mrf.mxu3  ;;  %v1802_v29 = vmul.f32 %v1779_v6, %v943_v40  ;;  %v1803_v32 = vmul.f32 %v1799_v7, %v944_v42 }
 0x2ff   : > { %v1804_v21 = vadd.f32 %v1802_v29, %v1745_v20  ;;  %v1805_v8 = vadd.f32 %v1803_v32, %v1746_v33 }
 0x301   : > { %v1855_v22 = vadd.f32 %v1832_v27, %v1804_v21  ;;  %v1856_v24 = vadd.f32 %v1852_v16, %v1805_v8 }
 0x304   : > { %v1889_v17 = vpop.f32.mrf.mxu0  ;;  %v1909_v18 = vpop.f32.mrf.mxu1 }
 0x305   : > { %v1912_v35 = vmul.f32 %v1889_v17, %v1168_v58  ;;  %v1913_v36 = vmul.f32 %v1909_v18, %v1169_v61  ;;  %v1948_v19 = vpop.f32.mrf.mxu2  ;;  %v1968_v59 = vpop.f32.mrf.mxu3 }
 0x306   : > { %v1971_v42 = vmul.f32 %v1948_v19, %v1291_v0  ;;  %v1972_v26 = vmul.f32 %v1968_v59, %v1292_v1 }
 0x307   : > { %v1914_v40 = vadd.f32 %v1912_v35, %v1855_v22  ;;  %v1915_v25 = vadd.f32 %v1913_v36, %v1856_v24 }
 0x309   : > { %v1973_v39 = vadd.f32 %v1971_v42, %v1914_v40  ;;  %v1974_v34 = vadd.f32 %v1972_v26, %v1915_v25 }
 0x30c   : > { %v2007_v31 = vpop.f32.mrf.mxu0  ;;  %v2027_v38 = vpop.f32.mrf.mxu1 }
 0x30d   : > { %v2030_v58 = vmul.f32 %v2007_v31, %v1414_v12  ;;  %v2031_v61 = vmul.f32 %v2027_v38, %v1415_v14  ;;  %v2066_v37 = vpop.f32.mrf.mxu2  ;;  %v2086_v41 = vpop.f32.mrf.mxu3 }
 0x30e   : > { %v2089_v43 = vmul.f32 %v2859_v28, %v2066_v37  ;;  %v2090_v0 = vmul.f32 %v2864_v30, %v2086_v41 }
 0x30f   : > { %v2032_v44 = vadd.f32 %v2030_v58, %v1973_v39  ;;  %v2033_v45 = vadd.f32 %v2031_v61, %v1974_v34 }
 0x311   : > { %v2091_v1 = vadd.f32 %v2089_v43, %v2032_v44  ;;  %v2092_v46 = vadd.f32 %v2090_v0, %v2033_v45 }
 0x313   : > { %v2099_v49 = vmul.f32 %v2097_v47, %v2091_v1  ;;  %v2100_v50 = vmul.f32 %v2097_v47, %v2092_v46 }
 0x315   : > { %v2107_v9 = vadd.f32 %v2105_v48, %v2099_v49  ;;  %v2108_v12 = vadd.f32 %v2105_v48, %v2100_v50 }
 0x317   : > { %v2110_v51 = vmax.f32 %v2108_v12, 0.0  ;;  %v2109_v23 = vmax.f32 %v2107_v9, 0.0 }
 0x319   : > { %v2113_v14 = vrot.slane %v2110_v51, 4 }
 0x31b   : > { %v2114_v28 = vsel %vm479_vm2, %v2109_v23, %v2113_v14 }
 0x31c   : > { %2116 = vst [vmem:[%s376_s27] sm:$0xff] %v2114_v28 }
 0x31d PF: > { %s20_s13 = sadd.s32 1, %s2337_s13  }
 0x31e   : > { %p17_p4 = scmp.ge.s32.totalorder %s20_s13, 4  }
 0x320   :  { %19 = sbr.rel (!%p17_p4) target bundleno = 1 (0x1), region = 93 }

</bundles_post_ra>
